<compile_context>
chip_gen: v6e
topology: v6e:2x2x1
jax: 0.10.0
libtpu: 0.0.40
codegen_flags: <defaults>
</compile_context>

<pallas_src>
import functools

import jax
import jax.numpy as jnp
from jax.experimental import pallas as pl
from jax.experimental.pallas import tpu as pltpu


def _gated_mlp_kernel(x_ref, t_ref, lbl_ref,
                      w1x_ref, w1t_ref, w1l_ref, b1_ref,
                      w2_ref, b2_ref,
                      out_ref, *, num_classes, d_out):
    """Fused  net(t,x,label) * sigmoid(net_w(t,x,label))  for one batch tile."""
    x = x_ref[...]                            # (TB, D)   f32
    t = t_ref[...]                            # (TB, 1)   f32
    lbl = lbl_ref[...]                        # (TB, 1)   i32
    tb = x.shape[0]

    # In-kernel one_hot(label): iota over classes == label.
    iota = jax.lax.broadcasted_iota(jnp.int32, (tb, num_classes), 1)
    onehot = (iota == lbl).astype(jnp.bfloat16)           # (TB, C)

    # ---- layer 1: net and net_w fused along the 2H output axis -------------
    # bf16 MXU inputs, f32 accumulation.
    h = jnp.dot(x.astype(jnp.bfloat16), w1x_ref[...],
                preferred_element_type=jnp.float32)        # x term     (TB,2H)
    h = h + jnp.dot(onehot, w1l_ref[...],
                    preferred_element_type=jnp.float32)    # label term
    h = h + t * w1t_ref[...]                               # time term (VPU, f32)
    h = jnp.maximum(h + b1_ref[...], 0.0)                  # bias + relu, f32

    # ---- layer 2: block-diagonal fused weight, one MXU pass (K = 2H = 128) -
    y_cat = jnp.dot(h.astype(jnp.bfloat16), w2_ref[...],
                    preferred_element_type=jnp.float32) + b2_ref[...]  # (TB,2D)

    y = y_cat[:, :d_out]                 # net(t, x, label)
    yw = y_cat[:, d_out:]                # net_w(t, x, label)
    out_ref[...] = (y * jax.nn.sigmoid(yw)).astype(out_ref.dtype)   # f32 epilogue


def _pick_batch_tile(b, max_tile=256):
    # Biggest tile (<= max_tile, sized well within v7x's 64 MiB VMEM with
    # double-buffering) that divides the batch.
    for cand in (max_tile, 128, 64, 32, 16, 8):
        if cand <= b and b % cand == 0:
            return cand
    return b


def gated_wrapper_forward(t, x, label, params, num_classes):
    """Equivalent of wrapper.forward(t, x) with label fixed at construction."""
    (w1, b1, w2, b2, w1w, b1w, w2w, b2w) = params
    B, D = x.shape
    H = w1.shape[1]

    # ---- glue: fuse the two networks' parameters (tiny, done outside) ------
    # reference feature order is [x, t, one_hot(label)] along W1 rows.
    w1x = jnp.concatenate([w1[:D], w1w[:D]], axis=1)                 # (D, 2H)
    w1t = jnp.concatenate([w1[D:D + 1], w1w[D:D + 1]], axis=1)       # (1, 2H)
    w1l = jnp.concatenate([w1[D + 1:], w1w[D + 1:]], axis=1)         # (C, 2H)
    b1c = jnp.concatenate([b1, b1w], axis=1)                         # (1, 2H)
    zH = jnp.zeros((H, D), jnp.float32)
    w2c = jnp.concatenate(
        [jnp.concatenate([w2, zH], axis=1),
         jnp.concatenate([zH, w2w], axis=1)], axis=0)                # (2H, 2D)
    b2c = jnp.concatenate([b2, b2w], axis=1)                         # (1, 2D)

    # bf16 MXU inputs (halves weight DMA); accumulation stays f32 in-kernel.
    w1x = w1x.astype(jnp.bfloat16)
    w1l = w1l.astype(jnp.bfloat16)
    w2c = w2c.astype(jnp.bfloat16)

    t2 = t.reshape(B, 1).astype(jnp.float32)
    lbl2 = label.reshape(B, 1).astype(jnp.int32)
    x32 = x.astype(jnp.float32)

    tile_b = _pick_batch_tile(B)
    grid = (B // tile_b,)

    def row_spec(width):
        return pl.BlockSpec((tile_b, width), lambda i: (i, 0))

    def full_spec(arr):
        return pl.BlockSpec(arr.shape, lambda i: (0, 0))   # weight stays resident

    flops = int(2 * B * (D * 2 * H + num_classes * 2 * H + 2 * H * 2 * D)
                + 8 * B * H + 2 * B * D)
    bytes_accessed = int(
        x32.size * 4 + t2.size * 4 + lbl2.size * 4 + B * D * 4
        + w1x.size * 2 + w1l.size * 2 + w2c.size * 2
        + w1t.size * 4 + b1c.size * 4 + b2c.size * 4)

    kernel = functools.partial(_gated_mlp_kernel,
                               num_classes=num_classes, d_out=D)

    out = pl.pallas_call(
        kernel,
        out_shape=jax.ShapeDtypeStruct((B, D), jnp.float32),
        grid=grid,
        in_specs=[
            row_spec(D),          # x
            row_spec(1),          # t
            row_spec(1),          # label
            full_spec(w1x), full_spec(w1t), full_spec(w1l), full_spec(b1c),
            full_spec(w2c), full_spec(b2c),
        ],
        out_specs=row_spec(D),
        compiler_params=pltpu.CompilerParams(
            dimension_semantics=("parallel",)),
        cost_estimate=pl.CostEstimate(
            flops=flops,
            transcendentals=int(B * D),
            bytes_accessed=bytes_accessed),
    )(x32, t2, lbl2, w1x, w1t, w1l, b1c, w2c, b2c)
    return out


def init_params(key, din, hidden, dout):
    ks = jax.random.split(key, 8)
    s1 = 1.0 / jnp.sqrt(din)
    s2 = 1.0 / jnp.sqrt(hidden)
    w1 = jax.random.normal(ks[0], (din, hidden), jnp.float32) * s1
    b1 = jax.random.normal(ks[1], (1, hidden), jnp.float32) * 0.01
    w2 = jax.random.normal(ks[2], (hidden, dout), jnp.float32) * s2
    b2 = jax.random.normal(ks[3], (1, dout), jnp.float32) * 0.01
    w1w = jax.random.normal(ks[4], (din, hidden), jnp.float32) * s1
    b1w = jax.random.normal(ks[5], (1, hidden), jnp.float32) * 0.01
    w2w = jax.random.normal(ks[6], (hidden, dout), jnp.float32) * s2
    b2w = jax.random.normal(ks[7], (1, dout), jnp.float32) * 0.01
    return (w1, b1, w2, b2, w1w, b1w, w2w, b2w)


def reference_forward(t, x, label, params, num_classes):
    """Pure-JAX f32 reference of the same computation."""
    (w1, b1, w2, b2, w1w, b1w, w2w, b2w) = params
    B = x.shape[0]
    feat = jnp.concatenate(
        [x, t.reshape(B, 1), jax.nn.one_hot(label, num_classes, dtype=jnp.float32)],
        axis=-1,
    )
    y = jnp.maximum(feat @ w1 + b1, 0.0) @ w2 + b2
    yw = jnp.maximum(feat @ w1w + b1w, 0.0) @ w2w + b2w
    return y * jax.nn.sigmoid(yw)


if __name__ == "__main__":
    B, D, H, C = 512, 32, 64, 4        # batch, feature dim, hidden, num labels
    DIN = D + 1 + C                    # x ++ t ++ one_hot(label)

    key = jax.random.PRNGKey(0)
    k_x, k_t, k_l, k_p = jax.random.split(key, 4)

    x = jax.random.normal(k_x, (B, D), jnp.float32)
    t = jax.random.uniform(k_t, (B,), jnp.float32)
    label = jax.random.randint(k_l, (B,), 0, C)
    params = init_params(k_p, DIN, H, D)

    out = jax.block_until_ready(gated_wrapper_forward(t, x, label, params, C))
    ref = reference_forward(t, x, label, params, C)

    assert out.shape == (B, D)
    # bf16 MXU inputs with f32 accumulation: ~1e-2-scale deviation vs f32 ref.
    assert jnp.allclose(out, ref, atol=5e-2, rtol=5e-2), \
        float(jnp.max(jnp.abs(out - ref)))

    print("KERNEL_OK")
</pallas_src>

<mosaic_0001>
module attributes {stable_mosaic.version = 11 : i64} {
  func.func @_gated_mlp_kernel(%arg0: i32, %arg1: memref<256x32xf32, #tpu.memory_space<vmem>>, %arg2: memref<256x1xf32, #tpu.memory_space<vmem>>, %arg3: memref<256x1xi32, #tpu.memory_space<vmem>>, %arg4: memref<32x128xbf16, #tpu.memory_space<vmem>>, %arg5: memref<1x128xf32, #tpu.memory_space<vmem>>, %arg6: memref<4x128xbf16, #tpu.memory_space<vmem>>, %arg7: memref<1x128xf32, #tpu.memory_space<vmem>>, %arg8: memref<128x64xbf16, #tpu.memory_space<vmem>>, %arg9: memref<1x64xf32, #tpu.memory_space<vmem>>, %arg10: memref<256x32xf32, #tpu.memory_space<vmem>>) attributes {dimension_semantics = [#tpu.dimension_semantics<parallel>], iteration_bounds = array<i64: 2>, scalar_prefetch = 0 : i64, scratch_operands = 0 : i64, tpu.core_type = #tpu.core_type<tc>, window_params = [{transform_indices = @transform_0, window_bounds = array<i64: 256, 32>}, {transform_indices = @transform_1, window_bounds = array<i64: 256, 1>}, {transform_indices = @transform_2, window_bounds = array<i64: 256, 1>}, {pipeline_mode = #tpu.pipeline_mode<synchronous>, transform_indices = @transform_3, window_bounds = array<i64: 32, 128>}, {pipeline_mode = #tpu.pipeline_mode<synchronous>, transform_indices = @transform_4, window_bounds = array<i64: 1, 128>}, {pipeline_mode = #tpu.pipeline_mode<synchronous>, transform_indices = @transform_5, window_bounds = array<i64: 4, 128>}, {pipeline_mode = #tpu.pipeline_mode<synchronous>, transform_indices = @transform_6, window_bounds = array<i64: 1, 128>}, {pipeline_mode = #tpu.pipeline_mode<synchronous>, transform_indices = @transform_7, window_bounds = array<i64: 128, 64>}, {pipeline_mode = #tpu.pipeline_mode<synchronous>, transform_indices = @transform_8, window_bounds = array<i64: 1, 64>}, {transform_indices = @transform_9, window_bounds = array<i64: 256, 32>}]} {
    %c0 = arith.constant 0 : index
    %c0_0 = arith.constant 0 : index
    %0 = vector.load %arg1[%c0, %c0_0] : memref<256x32xf32, #tpu.memory_space<vmem>>, vector<256x32xf32>
    %c0_1 = arith.constant 0 : index
    %c0_2 = arith.constant 0 : index
    %1 = vector.load %arg2[%c0_1, %c0_2] : memref<256x1xf32, #tpu.memory_space<vmem>>, vector<256x1xf32>
    %c0_3 = arith.constant 0 : index
    %c0_4 = arith.constant 0 : index
    %2 = vector.load %arg3[%c0_3, %c0_4] : memref<256x1xi32, #tpu.memory_space<vmem>>, vector<256x1xi32>
    %3 = tpu.iota {dimensions = array<i32: 1>} : vector<256x4xi32>
    %4 = vector.broadcast %2 : vector<256x1xi32> to vector<256x4xi32>
    %5 = arith.cmpi eq, %3, %4 : vector<256x4xi32>
    %6 = arith.extui %5 : vector<256x4xi1> to vector<256x4xi32>
    %7 = arith.sitofp %6 : vector<256x4xi32> to vector<256x4xf32>
    %8 = arith.truncf %7 : vector<256x4xf32> to vector<256x4xbf16>
    %9 = arith.truncf %0 : vector<256x32xf32> to vector<256x32xbf16>
    %c0_5 = arith.constant 0 : index
    %c0_6 = arith.constant 0 : index
    %10 = vector.load %arg4[%c0_5, %c0_6] : memref<32x128xbf16, #tpu.memory_space<vmem>>, vector<32x128xbf16>
    %cst = arith.constant dense<0.000000e+00> : vector<256x128xf32>
    %11 = tpu.matmul %9, %10, %cst {dimension_numbers = #tpu.dot_dimension_numbers<[1], [0], [0], [1], [0, 0, 1, 1], [], []>} : vector<256x32xbf16>, vector<32x128xbf16>, vector<256x128xf32> -> vector<256x128xf32>
    %c0_7 = arith.constant 0 : index
    %c0_8 = arith.constant 0 : index
    %12 = vector.load %arg6[%c0_7, %c0_8] : memref<4x128xbf16, #tpu.memory_space<vmem>>, vector<4x128xbf16>
    %cst_9 = arith.constant dense<0.000000e+00> : vector<256x128xf32>
    %13 = tpu.matmul %8, %12, %cst_9 {dimension_numbers = #tpu.dot_dimension_numbers<[1], [0], [0], [1], [0, 0, 1, 1], [], []>} : vector<256x4xbf16>, vector<4x128xbf16>, vector<256x128xf32> -> vector<256x128xf32>
    %14 = arith.addf %11, %13 : vector<256x128xf32>
    %c0_10 = arith.constant 0 : index
    %c0_11 = arith.constant 0 : index
    %15 = vector.load %arg5[%c0_10, %c0_11] : memref<1x128xf32, #tpu.memory_space<vmem>>, vector<1x128xf32>
    %16 = vector.broadcast %1 : vector<256x1xf32> to vector<256x128xf32>
    %17 = vector.broadcast %15 : vector<1x128xf32> to vector<256x128xf32>
    %18 = arith.mulf %16, %17 : vector<256x128xf32>
    %19 = arith.addf %14, %18 : vector<256x128xf32>
    %c0_12 = arith.constant 0 : index
    %c0_13 = arith.constant 0 : index
    %20 = vector.load %arg7[%c0_12, %c0_13] : memref<1x128xf32, #tpu.memory_space<vmem>>, vector<1x128xf32>
    %21 = vector.broadcast %20 : vector<1x128xf32> to vector<256x128xf32>
    %22 = arith.addf %19, %21 : vector<256x128xf32>
    %cst_14 = arith.constant 0.000000e+00 : f32
    %23 = vector.broadcast %cst_14 : f32 to vector<256x128xf32>
    %24 = arith.maximumf %22, %23 : vector<256x128xf32>
    %25 = arith.truncf %24 : vector<256x128xf32> to vector<256x128xbf16>
    %c0_15 = arith.constant 0 : index
    %c0_16 = arith.constant 0 : index
    %26 = vector.load %arg8[%c0_15, %c0_16] : memref<128x64xbf16, #tpu.memory_space<vmem>>, vector<128x64xbf16>
    %cst_17 = arith.constant dense<0.000000e+00> : vector<256x64xf32>
    %27 = tpu.matmul %25, %26, %cst_17 {dimension_numbers = #tpu.dot_dimension_numbers<[1], [0], [0], [1], [0, 0, 1, 1], [], []>} : vector<256x128xbf16>, vector<128x64xbf16>, vector<256x64xf32> -> vector<256x64xf32>
    %c0_18 = arith.constant 0 : index
    %c0_19 = arith.constant 0 : index
    %28 = vector.load %arg9[%c0_18, %c0_19] : memref<1x64xf32, #tpu.memory_space<vmem>>, vector<1x64xf32>
    %29 = vector.broadcast %28 : vector<1x64xf32> to vector<256x64xf32>
    %30 = arith.addf %27, %29 : vector<256x64xf32>
    %31 = vector.extract_strided_slice %30 {offsets = [0, 0], sizes = [256, 32], strides = [1, 1]} : vector<256x64xf32> to vector<256x32xf32>
    %32 = vector.extract_strided_slice %30 {offsets = [0, 32], sizes = [256, 32], strides = [1, 1]} : vector<256x64xf32> to vector<256x32xf32>
    %33 = arith.negf %32 : vector<256x32xf32>
    %34 = math.exp %33 : vector<256x32xf32>
    %cst_20 = arith.constant 1.000000e+00 : f32
    %35 = vector.broadcast %cst_20 : f32 to vector<256x32xf32>
    %36 = arith.addf %35, %34 : vector<256x32xf32>
    %37 = arith.divf %35, %36 : vector<256x32xf32>
    %38 = arith.mulf %31, %37 : vector<256x32xf32>
    %c0_21 = arith.constant 0 : index
    %c0_22 = arith.constant 0 : index
    %39 = vector.load %arg10[%c0_21, %c0_22] : memref<256x32xf32, #tpu.memory_space<vmem>>, vector<256x32xf32>
    tpu.vector_store %arg10[%c0_21, %c0_22], %38 {strides = array<i32>} : memref<256x32xf32, #tpu.memory_space<vmem>>, vector<256x32xf32>,
    return
  }
  func.func @transform_0(%arg0: i32) -> (i32, i32) {
    %c0_i32 = arith.constant 0 : i32
    %c0_i32_0 = arith.constant 0 : i32
    return %arg0, %c0_i32 : i32, i32
  }
  func.func @transform_1(%arg0: i32) -> (i32, i32) {
    %c0_i32 = arith.constant 0 : i32
    %c0_i32_0 = arith.constant 0 : i32
    return %arg0, %c0_i32 : i32, i32
  }
  func.func @transform_2(%arg0: i32) -> (i32, i32) {
    %c0_i32 = arith.constant 0 : i32
    %c0_i32_0 = arith.constant 0 : i32
    return %arg0, %c0_i32 : i32, i32
  }
  func.func @transform_3(%arg0: i32) -> (i32, i32) {
    %c0_i32 = arith.constant 0 : i32
    %c0_i32_0 = arith.constant 0 : i32
    %c0_i32_1 = arith.constant 0 : i32
    return %c0_i32, %c0_i32_0 : i32, i32
  }
  func.func @transform_4(%arg0: i32) -> (i32, i32) {
    %c0_i32 = arith.constant 0 : i32
    %c0_i32_0 = arith.constant 0 : i32
    %c0_i32_1 = arith.constant 0 : i32
    return %c0_i32, %c0_i32_0 : i32, i32
  }
  func.func @transform_5(%arg0: i32) -> (i32, i32) {
    %c0_i32 = arith.constant 0 : i32
    %c0_i32_0 = arith.constant 0 : i32
    %c0_i32_1 = arith.constant 0 : i32
    return %c0_i32, %c0_i32_0 : i32, i32
  }
  func.func @transform_6(%arg0: i32) -> (i32, i32) {
    %c0_i32 = arith.constant 0 : i32
    %c0_i32_0 = arith.constant 0 : i32
    %c0_i32_1 = arith.constant 0 : i32
    return %c0_i32, %c0_i32_0 : i32, i32
  }
  func.func @transform_7(%arg0: i32) -> (i32, i32) {
    %c0_i32 = arith.constant 0 : i32
    %c0_i32_0 = arith.constant 0 : i32
    %c0_i32_1 = arith.constant 0 : i32
    return %c0_i32, %c0_i32_0 : i32, i32
  }
  func.func @transform_8(%arg0: i32) -> (i32, i32) {
    %c0_i32 = arith.constant 0 : i32
    %c0_i32_0 = arith.constant 0 : i32
    %c0_i32_1 = arith.constant 0 : i32
    return %c0_i32, %c0_i32_0 : i32, i32
  }
  func.func @transform_9(%arg0: i32) -> (i32, i32) {
    %c0_i32 = arith.constant 0 : i32
    %c0_i32_0 = arith.constant 0 : i32
    return %arg0, %c0_i32 : i32, i32
  }
}

</mosaic_0001>

<bundles_post_ra>
// kernel: tpu_custom_call.1
= control target key start
LH: loop header
LB: loop body
LE: loop exit
PB: predicated region body
PF: predicated region fallthrough
CT: control target
= control target key end

     0   :  { %s2675_s30 = smov 0   ;;  %s3368_s0 = inlined_call_operand.vmem [shape: f32[512,32], index: 0, kind: input, shape index: {}]   ;;  %s3369_s1 = inlined_call_operand.vmem [shape: f32[512,1], index: 1, kind: input, shape index: {}]   ;;  %s3370_s2 = inlined_call_operand.vmem [shape: s32[512,1], index: 2, kind: input, shape index: {}]   ;;  %s3371_s3 = inlined_call_operand.vmem [shape: bf16[32,128], index: 3, kind: input, shape index: {}]   ;;  %s3372_s4 = inlined_call_operand.vmem [shape: f32[1,128], index: 4, kind: input, shape index: {}]   ;;  %s3373_s5 = inlined_call_operand.vmem [shape: bf16[4,128], index: 5, kind: input, shape index: {}]   ;;  %s3374_s6 = inlined_call_operand.vmem [shape: f32[1,128], index: 6, kind: input, shape index: {}]   ;;  %s3375_s7 = inlined_call_operand.vmem [shape: bf16[128,64], index: 7, kind: input, shape index: {}]   ;;  %s3376_s8 = inlined_call_operand.vmem [shape: f32[1,64], index: 8, kind: input, shape index: {}]   ;;  %s3377_s9 = inlined_call_operand.vmem [shape: f32[512,32], index: 9, kind: output, shape index: {}]  }
   0x1 LB: > { %s2158_s10 = sadd.s32 4294967295, %s2620_s30   ;;  %p2162_p0 = scmp.ge.s32.totalorder %s2620_s30, 1  ;;  %s2620_s30 = sphi %s2675_s30, %s19_s30  }
   0x2   : > { %p310_p1 = scmp.lt.s32.totalorder %s2620_s30, 3 }
   0x4   : > { %p311_p2 = pnand %p2162_p0, %p310_p1 }
   0x5   : > { %s2163_s11 = sshll.u32 (!%p311_p2), %s2158_s10, 5 }
   0x6   : > { %314 = sbr.rel (%p311_p2) target bundleno = 803 (0x323), region = 56  ;;  %p357_p3 = scmp.lt.s32.totalorder (!%p311_p2), %s2163_s11, 63 }
   0xb   : > { %v2622_v0 = vmov 0   ;;  %s3379_s11 = smov (!%p357_p3, %s2163_s11), 63  ;;  %vm757_vm0 = vcmask 1041408   ;;  %v707_v14 = vld [vmem:[%s3373_s5] sm:$0x3]  ;;  %v2710_v15 = vld [vmem:[%s3371_s3 + $0x8] sm:$0xff]  }
   0xc   : > { %2475 = vset.pattern.permute.xlu1 %v2622_v0  ;;  %2474 = vset.pattern.permute.xlu0 %v2622_v0  ;;  %s2683_s12 = sshll.u32 %s3379_s11, 3  ;;  %v759_v17 = vsel %vm757_vm0, %v707_v14, 0  ;;  %vm708_vm5 = vcmask 31744   ;;  %s2624_s11 = smov 96  }
   0xd   : > { %s2689_s15 = scalar_lea.vmem %s3370_s2, %s2683_s12  ;;  %2462 = vmatprep.subr.msk.bf16.mxu1 %vm757_vm0, %v707_v14  ;;  %2461 = vmatprep.subr.msk.bf16.mxu0 %vm757_vm0, %v707_v14  ;;  %s2736_s22 = scalar_lea.vmem %s3369_s1, %s2683_s12 }
   0xe   : > { %v463_v1 = vld [vmem:[%s2689_s15 + $0x90] sm:$0xff]  ;;  %v461_v2 = vld [vmem:[%s2689_s15 + $0x80] sm:$0xff]  ;;  %v464_v3 = vld [vmem:[%s2689_s15 + $0x98] sm:$0xff]  ;;  %2460 = vmatpush3.bf16.msra.mxu1 %v759_v17  ;;  %2342 = vmatpush3.bf16.msra.mxu0 %v759_v17  ;;  %s2811_s27 = scalar_lea.vmem %s3368_s0, %s2683_s12 }
   0xf   : > { %534 = vperm.xlu1 %2475, %v463_v1   ;;  %528 = vperm.xlu0 %2474, %v461_v2   ;;  %v462_v4 = vld [vmem:[%s2689_s15 + $0x88] sm:$0xff]  ;;  %v465_v6 = vld [vmem:[%s2689_s15 + $0xa0] sm:$0xff]  ;;  %v468_v7 = vld [vmem:[%s2689_s15 + $0xb8] sm:$0xff]  ;;  %v477_v2 = vlaneseq }
  0x10   : > { %v466_v5 = vld [vmem:[%s2689_s15 + $0xa8] sm:$0xff]  ;;  %v467_v8 = vld [vmem:[%s2689_s15 + $0xb0] sm:$0xff]  ;;  %v469_v10 = vld [vmem:[%s2689_s15 + $0xc0] sm:$0xff]  ;;  %2375 = vmatprep.subr.bf16.mxu1 %v2710_v15 }
  0x11   : > { %v470_v9 = vld [vmem:[%s2689_s15 + $0xc8] sm:$0xff]  ;;  %v472_v11 = vld [vmem:[%s2689_s15 + $0xd8] sm:$0xff]  ;;  %v471_v12 = vld [vmem:[%s2689_s15 + $0xd0] sm:$0xff] }
  0x12   : > { %v474_v13 = vld [vmem:[%s2689_s15 + $0xe8] sm:$0xff]  ;;  %v473_v16 = vld [vmem:[%s2689_s15 + $0xe0] sm:$0xff]  ;;  %v476_v18 = vld [vmem:[%s2689_s15 + $0xf8] sm:$0xff] }
  0x13   : > { %537 = vperm.xlu1 %2475, %v464_v3   ;;  %531 = vperm.xlu0 %2474, %v462_v4   ;;  %v475_v19 = vld [vmem:[%s2689_s15 + $0xf0] sm:$0xff]  ;;  %v446_v20 = vld [vmem:[%s2689_s15 + $0x8] sm:$0xff]  ;;  %v445_v21 = vld [vmem:[%s2689_s15] sm:$0xff] }
  0x14   : > { %v448_v22 = vld [vmem:[%s2689_s15 + $0x18] sm:$0xff]  ;;  %v447_v23 = vld [vmem:[%s2689_s15 + $0x10] sm:$0xff]  ;;  %v450_v24 = vld [vmem:[%s2689_s15 + $0x28] sm:$0xff] }
  0x15   : > { %v449_v25 = vld [vmem:[%s2689_s15 + $0x20] sm:$0xff]  ;;  %v452_v26 = vld [vmem:[%s2689_s15 + $0x38] sm:$0xff]  ;;  %v451_v27 = vld [vmem:[%s2689_s15 + $0x30] sm:$0xff] }
  0x16   : > { %v454_v28 = vld [vmem:[%s2689_s15 + $0x48] sm:$0xff]  ;;  %v453_v29 = vld [vmem:[%s2689_s15 + $0x40] sm:$0xff]  ;;  %v456_v30 = vld [vmem:[%s2689_s15 + $0x58] sm:$0xff] }
  0x17   : > { %543 = vperm.xlu1 %2475, %v466_v5   ;;  %540 = vperm.xlu0 %2474, %v465_v6   ;;  %v455_v31 = vld [vmem:[%s2689_s15 + $0x50] sm:$0xff]  ;;  %v458_v32 = vld [vmem:[%s2689_s15 + $0x68] sm:$0xff]  ;;  %v457_v33 = vld [vmem:[%s2689_s15 + $0x60] sm:$0xff]  ;;  %v2770_v5 = vand.u32 127, %v477_v2 }
  0x18   : > { %v460_v34 = vld [vmem:[%s2689_s15 + $0x78] sm:$0xff]  ;;  %v459_v35 = vld [vmem:[%s2689_s15 + $0x70] sm:$0xff]  ;;  %v414_v36 = vld [vmem:[%s2736_s22 + $0x8] sm:$0xff]  ;;  %s3267_s15 = scalar_lea.vmem %s3377_s9, %s2683_s12 }
  0x19   : > { %v413_v37 = vld [vmem:[%s2736_s22] sm:$0xff]  ;;  %v416_v38 = vld [vmem:[%s2736_s22 + $0x18] sm:$0xff]  ;;  %v415_v39 = vld [vmem:[%s2736_s22 + $0x10] sm:$0xff] }
  0x1a   : > { %v418_v40 = vld [vmem:[%s2736_s22 + $0x28] sm:$0xff]  ;;  %v417_v41 = vld [vmem:[%s2736_s22 + $0x20] sm:$0xff]  ;;  %v420_v42 = vld [vmem:[%s2736_s22 + $0x38] sm:$0xff] }
  0x1b   : > { %549 = vperm.xlu1 %2475, %v468_v7   ;;  %546 = vperm.xlu0 %2474, %v467_v8   ;;  %v419_v43 = vld [vmem:[%s2736_s22 + $0x30] sm:$0xff]  ;;  %v422_v44 = vld [vmem:[%s2736_s22 + $0x48] sm:$0xff]  ;;  %v421_v45 = vld [vmem:[%s2736_s22 + $0x40] sm:$0xff] }
  0x1c   : > { %v424_v46 = vld [vmem:[%s2736_s22 + $0x58] sm:$0xff]  ;;  %v423_v47 = vld [vmem:[%s2736_s22 + $0x50] sm:$0xff]  ;;  %v426_v48 = vld [vmem:[%s2736_s22 + $0x68] sm:$0xff] }
  0x1d   : > { %v425_v49 = vld [vmem:[%s2736_s22 + $0x60] sm:$0xff]  ;;  %v428_v50 = vld [vmem:[%s2736_s22 + $0x78] sm:$0xff]  ;;  %v427_v51 = vld [vmem:[%s2736_s22 + $0x70] sm:$0xff] }
  0x1e   : > { %v430_v52 = vld [vmem:[%s2736_s22 + $0x88] sm:$0xff]  ;;  %v429_v53 = vld [vmem:[%s2736_s22 + $0x80] sm:$0xff]  ;;  %v432_v54 = vld [vmem:[%s2736_s22 + $0x98] sm:$0xff] }
  0x1f   : > { %555 = vperm.xlu1 %2475, %v470_v9   ;;  %552 = vperm.xlu0 %2474, %v469_v10   ;;  %v431_v55 = vld [vmem:[%s2736_s22 + $0x90] sm:$0xff]  ;;  %v434_v56 = vld [vmem:[%s2736_s22 + $0xa8] sm:$0xff]  ;;  %v433_v57 = vld [vmem:[%s2736_s22 + $0xa0] sm:$0xff]  ;;  %v2623_v10 = vmov 0.0  }
  0x20   : > { %v436_v58 = vld [vmem:[%s2736_s22 + $0xb8] sm:$0xff]  ;;  %v435_v59 = vld [vmem:[%s2736_s22 + $0xb0] sm:$0xff]  ;;  %v438_v60 = vld [vmem:[%s2736_s22 + $0xc8] sm:$0xff] }
  0x21   : > { %v437_v61 = vld [vmem:[%s2736_s22 + $0xc0] sm:$0xff]  ;;  %v440_v62 = vld [vmem:[%s2736_s22 + $0xd8] sm:$0xff]  ;;  %v439_v63 = vld [vmem:[%s2736_s22 + $0xd0] sm:$0xff] }
  0x22   : > { %v442_v0 = vld [vmem:[%s2736_s22 + $0xe8] sm:$0xff]  ;;  %v441_v1 = vld [vmem:[%s2736_s22 + $0xe0] sm:$0xff]  ;;  %v444_v3 = vld [vmem:[%s2736_s22 + $0xf8] sm:$0xff] }
  0x23   : > { %561 = vperm.xlu1 %2475, %v472_v11   ;;  %558 = vperm.xlu0 %2474, %v471_v12   ;;  %v443_v4 = vld [vmem:[%s2736_s22 + $0xf0] sm:$0xff] }
  0x27   : > { %567 = vperm.xlu1 %2475, %v474_v13   ;;  %564 = vperm.xlu0 %2474, %v473_v16  }
  0x2b   : > { %573 = vperm.xlu1 %2475, %v476_v18   ;;  %570 = vperm.xlu0 %2474, %v475_v19  }
  0x2f   : > { %483 = vperm.xlu1 %2475, %v446_v20   ;;  %480 = vperm.xlu0 %2474, %v445_v21   ;;  %v2477_v20 = vld [vmem:[%s3371_s3] sm:$0xff]  }
  0x33   : > { %489 = vperm.xlu1 %2475, %v448_v22   ;;  %486 = vperm.xlu0 %2474, %v447_v23  }
  0x37   : > { %495 = vperm.xlu1 %2475, %v450_v24   ;;  %492 = vperm.xlu0 %2474, %v449_v25  }
  0x3b   : > { %501 = vperm.xlu1 %2475, %v452_v26   ;;  %498 = vperm.xlu0 %2474, %v451_v27  }
  0x3f   : > { %507 = vperm.xlu1 %2475, %v454_v28   ;;  %504 = vperm.xlu0 %2474, %v453_v29  }
  0x43   : > { %513 = vperm.xlu1 %2475, %v456_v30   ;;  %510 = vperm.xlu0 %2474, %v455_v31  }
  0x47   : > { %519 = vperm.xlu1 %2475, %v458_v32   ;;  %516 = vperm.xlu0 %2474, %v457_v33  }
  0x4b   : > { %525 = vperm.xlu1 %2475, %v460_v34   ;;  %522 = vperm.xlu0 %2474, %v459_v35  }
  0x4f   : > { %1152 = vperm.xlu1 %2475, %v414_v36   ;;  %1147 = vperm.xlu0 %2474, %v413_v37  }
  0x53   : > { %1162 = vperm.xlu1 %2475, %v416_v38   ;;  %1157 = vperm.xlu0 %2474, %v415_v39  }
  0x57   : > { %1172 = vperm.xlu1 %2475, %v418_v40   ;;  %1167 = vperm.xlu0 %2474, %v417_v41  }
  0x5b   : > { %1182 = vperm.xlu1 %2475, %v420_v42   ;;  %1177 = vperm.xlu0 %2474, %v419_v43  }
  0x5f   : > { %1192 = vperm.xlu1 %2475, %v422_v44   ;;  %1187 = vperm.xlu0 %2474, %v421_v45   ;;  %v381_v45 = vld [vmem:[%s2811_s27] sm:$0xff] }
  0x63   : > { %1202 = vperm.xlu1 %2475, %v424_v46   ;;  %1197 = vperm.xlu0 %2474, %v423_v47   ;;  %v382_v46 = vld [vmem:[%s2811_s27 + $0x8] sm:$0xff] }
  0x67   : > { %1212 = vperm.xlu1 %2475, %v426_v48   ;;  %1207 = vperm.xlu0 %2474, %v425_v49  }
  0x6b   : > { %1222 = vperm.xlu1 %2475, %v428_v50   ;;  %1217 = vperm.xlu0 %2474, %v427_v51   ;;  %v687_v50 = vpack.c.bf16 %v382_v46, %v381_v45  ;;  %v397_v46 = vld [vmem:[%s2811_s27 + $0x80] sm:$0xff] }
  0x6f   : > { %1232 = vperm.xlu1 %2475, %v430_v52   ;;  %1227 = vperm.xlu0 %2474, %v429_v53  }
  0x73   : > { %1242 = vperm.xlu1 %2475, %v432_v54   ;;  %1237 = vperm.xlu0 %2474, %v431_v55  }
  0x77   : > { %1252 = vperm.xlu1 %2475, %v434_v56   ;;  %1247 = vperm.xlu0 %2474, %v433_v57   ;;  %v383_v56 = vld [vmem:[%s2811_s27 + $0x10] sm:$0xff]  ;;  %v384_v57 = vld [vmem:[%s2811_s27 + $0x18] sm:$0xff] }
  0x7b   : > { %1262 = vperm.xlu1 %2475, %v436_v58   ;;  %1257 = vperm.xlu0 %2474, %v435_v59  }
  0x7f   : > { %1272 = vperm.xlu1 %2475, %v438_v60   ;;  %1267 = vperm.xlu0 %2474, %v437_v61   ;;  %v385_v60 = vld [vmem:[%s2811_s27 + $0x20] sm:$0xff]  ;;  %v386_v61 = vld [vmem:[%s2811_s27 + $0x28] sm:$0xff] }
  0x80   : > { %v689_v2 = vpack.c.bf16 %v386_v61, %v385_v60  ;;  %v406_v60 = vld [vmem:[%s2811_s27 + $0xc8] sm:$0xff] }
  0x83   : > { %1282 = vperm.xlu1 %2475, %v440_v62   ;;  %1277 = vperm.xlu0 %2474, %v439_v63  }
  0x87   : > { %1292 = vperm.xlu1 %2475, %v442_v0   ;;  %1287 = vperm.xlu0 %2474, %v441_v1   ;;  %v688_v0 = vpack.c.bf16 %v384_v57, %v383_v56  ;;  %v403_v57 = vld [vmem:[%s2811_s27 + $0xb0] sm:$0xff] }
  0x8a   : > { %v535_v6 = vpop.permute.xlu1 %534  ;;  %v529_v7 = vpop.permute.xlu0 %528 }
  0x8b   : > { %1302 = vperm.xlu1 %2475, %v444_v3   ;;  %1297 = vperm.xlu0 %2474, %v443_v4   ;;  %vm593_vm1 = vcmp.eq.s32.totalorder %v2770_v5, %v535_v6  ;;  %vm591_vm2 = vcmp.eq.s32.totalorder %v2770_v5, %v529_v7 }
  0x8c   : > { %v2189_v11 = vsel %vm593_vm1, 1.0, %v2623_v10  ;;  %v2187_v12 = vsel %vm591_vm2, 1.0, %v2623_v10  ;;  %vm934_vm2 = vcmask 261120  }
  0x8e   : > { %v538_v8 = vpop.permute.xlu1 %537  ;;  %v532_v9 = vpop.permute.xlu0 %531 }
  0x8f   : > { %vm594_vm3 = vcmp.eq.s32.totalorder %v2770_v5, %v538_v8  ;;  %vm592_vm4 = vcmp.eq.s32.totalorder %v2770_v5, %v532_v9  ;;  %v387_v9 = vld [vmem:[%s2811_s27 + $0x30] sm:$0xff] }
  0x90   : > { %v2190_v13 = vsel %vm594_vm3, 1.0, %v2623_v10  ;;  %v2188_v14 = vsel %vm592_vm4, 1.0, %v2623_v10 }
  0x91   : > { %v680_v16 = vpack.c.bf16 %v2190_v13, %v2189_v11  ;;  %v679_v17 = vpack.c.bf16 %v2188_v14, %v2187_v12  ;;  %v388_v11 = vld [vmem:[%s2811_s27 + $0x38] sm:$0xff]  ;;  %v389_v14 = vld [vmem:[%s2811_s27 + $0x40] sm:$0xff] }
  0x92   : > { %v544_v18 = vpop.permute.xlu1 %543  ;;  %v541_v19 = vpop.permute.xlu0 %540 }
  0x93   : > { %vm596_vm6 = vcmp.eq.s32.totalorder %v2770_v5, %v544_v18  ;;  %vm595_vm7 = vcmp.eq.s32.totalorder %v2770_v5, %v541_v19  ;;  %2359 = vmatprep.mubr.msk.bf16.mxu1 %vm708_vm5, %v679_v17  ;;  %v690_v19 = vpack.c.bf16 %v388_v11, %v387_v9  ;;  %v2479_v11 = vld [vmem:[%s3375_s7 + $0x30] sm:$0xff]  }
  0x94   : > { %v2192_v21 = vsel %vm596_vm6, 1.0, %v2623_v10  ;;  %v2191_v22 = vsel %vm595_vm7, 1.0, %v2623_v10  ;;  %2360 = vmatmul.mubr.msk.bf16.vlgmr.msra.gmra.mxu1 %vm708_vm5, %v680_v16  ;;  %v390_v16 = vld [vmem:[%s2811_s27 + $0x48] sm:$0xff] }
  0x95   : > { %v681_v23 = vpack.c.bf16 %v2192_v21, %v2191_v22  ;;  %2376 = vmatpush3.bf16.msra.mxu1 %v2710_v15  ;;  %v691_v21 = vpack.c.bf16 %v390_v16, %v389_v14  ;;  %v2482_v14 = vld [vmem:[%s3375_s7 + $0x18] sm:$0xff]   ;;  %v2483_v16 = vld [vmem:[%s3375_s7 + $0x10] sm:$0xff]  }
  0x96   : > { %v550_v24 = vpop.permute.xlu1 %549  ;;  %v547_v25 = vpop.permute.xlu0 %546  ;;  %2377 = vmatprep.subr.bf16.mxu1 %v2477_v20 }
  0x97   : > { %vm598_vm8 = vcmp.eq.s32.totalorder %v2770_v5, %v550_v24  ;;  %vm597_vm9 = vcmp.eq.s32.totalorder %v2770_v5, %v547_v25  ;;  %2363 = vmatprep.mubr.msk.bf16.mxu1 %vm708_vm5, %v681_v23 }
  0x98   : > { %v2194_v26 = vsel %vm598_vm8, 1.0, %v2623_v10  ;;  %v2193_v27 = vsel %vm597_vm9, 1.0, %v2623_v10 }
  0x99   : > { %v682_v28 = vpack.c.bf16 %v2194_v26, %v2193_v27  ;;  %2378 = vmatpush3.bf16.msra.mxu1 %v2477_v20  ;;  %v391_v27 = vld [vmem:[%s2811_s27 + $0x50] sm:$0xff] }
  0x9a   : > { %v556_v29 = vpop.permute.xlu1 %555  ;;  %v553_v30 = vpop.permute.xlu0 %552 }
  0x9b   : > { %vm600_vm10 = vcmp.eq.s32.totalorder %v2770_v5, %v556_v29  ;;  %vm599_vm11 = vcmp.eq.s32.totalorder %v2770_v5, %v553_v30 }
  0x9c   : > { %v2196_v15 = vsel %vm600_vm10, 1.0, %v2623_v10  ;;  %v2195_v31 = vsel %vm599_vm11, 1.0, %v2623_v10  ;;  %2364 = vmatmul.mubr.msk.bf16.gmra.mxu1 %vm708_vm5, %v682_v28  ;;  %v392_v28 = vld [vmem:[%s2811_s27 + $0x58] sm:$0xff] }
  0x9d   : > { %v683_v32 = vpack.c.bf16 %v2196_v15, %v2195_v31  ;;  %v393_v15 = vld [vmem:[%s2811_s27 + $0x60] sm:$0xff]  ;;  %v394_v31 = vld [vmem:[%s2811_s27 + $0x68] sm:$0xff] }
  0x9e   : > { %v562_v33 = vpop.permute.xlu1 %561  ;;  %v559_v34 = vpop.permute.xlu0 %558 }
  0x9f   : > { %vm602_vm12 = vcmp.eq.s32.totalorder %v2770_v5, %v562_v33  ;;  %vm601_vm13 = vcmp.eq.s32.totalorder %v2770_v5, %v559_v34  ;;  %2367 = vmatprep.mubr.msk.bf16.mxu1 %vm708_vm5, %v683_v32  ;;  %v692_v34 = vpack.c.bf16 %v392_v28, %v391_v27 }
  0xa0   : > { %v2198_v35 = vsel %vm602_vm12, 1.0, %v2623_v10  ;;  %v2197_v36 = vsel %vm601_vm13, 1.0, %v2623_v10 }
  0xa1   : > { %v684_v37 = vpack.c.bf16 %v2198_v35, %v2197_v36  ;;  %v693_v36 = vpack.c.bf16 %v394_v31, %v393_v15 }
  0xa2   : > { %v568_v38 = vpop.permute.xlu1 %567  ;;  %v565_v39 = vpop.permute.xlu0 %564 }
  0xa3   : > { %vm604_vm14 = vcmp.eq.s32.totalorder %v2770_v5, %v568_v38  ;;  %vm603_vm15 = vcmp.eq.s32.totalorder %v2770_v5, %v565_v39 }
  0xa4   : > { %v2200_v40 = vsel %vm604_vm14, 1.0, %v2623_v10  ;;  %v2199_v41 = vsel %vm603_vm15, 1.0, %v2623_v10  ;;  %2368 = vmatmul.mubr.msk.bf16.gmra.mxu1 %vm708_vm5, %v684_v37 }
  0xa5   : > { %v685_v42 = vpack.c.bf16 %v2200_v40, %v2199_v41 }
  0xa6   : > { %v574_v43 = vpop.permute.xlu1 %573  ;;  %v571_v44 = vpop.permute.xlu0 %570 }
  0xa7   : > { %vm606_vm0 = vcmp.eq.s32.totalorder %v2770_v5, %v574_v43  ;;  %vm605_vm1 = vcmp.eq.s32.totalorder %v2770_v5, %v571_v44  ;;  %2371 = vmatprep.mubr.msk.bf16.mxu1 %vm708_vm5, %v685_v42  ;;  %v395_v42 = vld [vmem:[%s2811_s27 + $0x70] sm:$0xff]  ;;  %v396_v43 = vld [vmem:[%s2811_s27 + $0x78] sm:$0xff] }
  0xa8   : > { %v2202_v47 = vsel %vm606_vm0, 1.0, %v2623_v10  ;;  %v2201_v48 = vsel %vm605_vm1, 1.0, %v2623_v10 }
  0xa9   : > { %v686_v49 = vpack.c.bf16 %v2202_v47, %v2201_v48  ;;  %v398_v47 = vld [vmem:[%s2811_s27 + $0x88] sm:$0xff] }
  0xaa   : > { %v484_v51 = vpop.permute.xlu1 %483  ;;  %v481_v52 = vpop.permute.xlu0 %480 }
  0xab   : > { %vm576_vm3 = vcmp.eq.s32.totalorder %v2770_v5, %v484_v51  ;;  %vm575_vm4 = vcmp.eq.s32.totalorder %v2770_v5, %v481_v52  ;;  %v695_v52 = vpack.c.bf16 %v398_v47, %v397_v46  ;;  %v2979_v47 = vld [vmem:[%s3372_s4] ss:$0 sm:$0xff] }
  0xac   : > { %v2172_v53 = vsel %vm576_vm3, 1.0, %v2623_v10  ;;  %v2171_v54 = vsel %vm575_vm4, 1.0, %v2623_v10  ;;  %2372 = vmatmul.mubr.msk.bf16.gmra.mxu1 %vm708_vm5, %v686_v49 }
  0xad   : > { %v671_v55 = vpack.c.bf16 %v2172_v53, %v2171_v54  ;;  %2379 = vmatprep.mubr.msk.bf16.mxu1 %vm934_vm2, %v687_v50  ;;  %v694_v50 = vpack.c.bf16 %v396_v43, %v395_v42  ;;  %v400_v53 = vld [vmem:[%s2811_s27 + $0x98] sm:$0xff]  ;;  %v401_v54 = vld [vmem:[%s2811_s27 + $0xa0] sm:$0xff] }
  0xae   : > { %v490_v58 = vpop.permute.xlu1 %489  ;;  %v487_v59 = vpop.permute.xlu0 %486 }
  0xaf   : > { %vm578_vm6 = vcmp.eq.s32.totalorder %v2770_v5, %v490_v58  ;;  %vm577_vm7 = vcmp.eq.s32.totalorder %v2770_v5, %v487_v59  ;;  %2343 = vmatprep.mubr.msk.bf16.mxu0 %vm708_vm5, %v671_v55  ;;  %v402_v55 = vld [vmem:[%s2811_s27 + $0xa8] sm:$0xff]  ;;  %v404_v58 = vld [vmem:[%s2811_s27 + $0xb8] sm:$0xff]  ;;  %v405_v59 = vld [vmem:[%s2811_s27 + $0xc0] sm:$0xff] }
  0xb0   : > { %v2174_v62 = vsel %vm578_vm6, 1.0, %v2623_v10  ;;  %v2173_v63 = vsel %vm577_vm7, 1.0, %v2623_v10  ;;  %v697_v56 = vpack.c.bf16 %v402_v55, %v401_v54  ;;  %v698_v61 = vpack.c.bf16 %v404_v58, %v403_v57 }
  0xb1   : > { %v672_v1 = vpack.c.bf16 %v2174_v62, %v2173_v63  ;;  %v699_v62 = vpack.c.bf16 %v406_v60, %v405_v59  ;;  %v407_v63 = vld [vmem:[%s2811_s27 + $0xd0] sm:$0xff] }
  0xb2   : > { %v496_v3 = vpop.permute.xlu1 %495  ;;  %v493_v4 = vpop.permute.xlu0 %492 }
  0xb3   : > { %vm580_vm8 = vcmp.eq.s32.totalorder %v2770_v5, %v496_v3  ;;  %vm579_vm9 = vcmp.eq.s32.totalorder %v2770_v5, %v493_v4  ;;  %2344 = vmatmul.mubr.msk.bf16.vlgmr.msra.gmra.mxu0 %vm708_vm5, %v672_v1  ;;  %v409_v1 = vld [vmem:[%s2811_s27 + $0xe0] sm:$0xff] }
  0xb4   : > { %v2176_v6 = vsel %vm580_vm8, 1.0, %v2623_v10  ;;  %v2175_v7 = vsel %vm579_vm9, 1.0, %v2623_v10  ;;  %2380 = vmatmul.mubr.msk.bf16.vlgmr.msra.gmra.mxu1 %vm934_vm2, %v688_v0  ;;  %v408_v0 = vld [vmem:[%s2811_s27 + $0xd8] sm:$0xff] }
  0xb5   : > { %v673_v8 = vpack.c.bf16 %v2176_v6, %v2175_v7  ;;  %2383 = vmatprep.mubr.msk.bf16.mxu1 %vm934_vm2, %v689_v2  ;;  %v410_v2 = vld [vmem:[%s2811_s27 + $0xe8] sm:$0xff]  ;;  %v700_v3 = vpack.c.bf16 %v408_v0, %v407_v63  ;;  %v2478_v6 = vld [vmem:[%s3375_s7 + $0x38] sm:$0xff]   ;;  %v411_v7 = vld [vmem:[%s2811_s27 + $0xf0] sm:$0xff] }
  0xb6   : > { %v502_v12 = vpop.permute.xlu1 %501  ;;  %v499_v13 = vpop.permute.xlu0 %498  ;;  %v701_v4 = vpack.c.bf16 %v410_v2, %v409_v1  ;;  %2411 = vmatprep.subr.bf16.mxu0 %v2478_v6  ;;  %v2994_v1 = vld [vmem:[%s3374_s6] ss:$0 sm:$0xff] }
  0xb7   : > { %vm582_vm10 = vcmp.eq.s32.totalorder %v2770_v5, %v502_v12  ;;  %vm581_vm11 = vcmp.eq.s32.totalorder %v2770_v5, %v499_v13  ;;  %2347 = vmatprep.mubr.msk.bf16.mxu0 %vm708_vm5, %v673_v8  ;;  %v412_v8 = vld [vmem:[%s2811_s27 + $0xf8] sm:$0xff]  ;;  %2412 = vmatpush3.bf16.msra.mxu0 %v2478_v6  ;;  %v2480_v12 = vld [vmem:[%s3375_s7 + $0x28] sm:$0xff]   ;;  %v2481_v13 = vld [vmem:[%s3375_s7 + $0x20] sm:$0xff]  }
  0xb8   : > { %v2178_v17 = vsel %vm582_vm10, 1.0, %v2623_v10  ;;  %v2177_v18 = vsel %vm581_vm11, 1.0, %v2623_v10  ;;  %v702_v9 = vpack.c.bf16 %v412_v8, %v411_v7  ;;  %2413 = vmatprep.subr.bf16.mxu0 %v2479_v11 }
  0xb9   : > { %v674_v20 = vpack.c.bf16 %v2178_v17, %v2177_v18  ;;  %v2484_v17 = vld [vmem:[%s3375_s7 + $0x8] sm:$0xff]   ;;  %v2485_v18 = vld [vmem:[%s3375_s7] sm:$0xff]  }
  0xba   : > { %v508_v22 = vpop.permute.xlu1 %507  ;;  %v505_v23 = vpop.permute.xlu0 %504 }
  0xbb   : > { %vm584_vm12 = vcmp.eq.s32.totalorder %v2770_v5, %v508_v22  ;;  %vm583_vm13 = vcmp.eq.s32.totalorder %v2770_v5, %v505_v23  ;;  %2348 = vmatmul.mubr.msk.bf16.gmra.mxu0 %vm708_vm5, %v674_v20 }
  0xbc   : > { %v2180_v24 = vsel %vm584_vm12, 1.0, %v2623_v10  ;;  %v2179_v25 = vsel %vm583_vm13, 1.0, %v2623_v10  ;;  %2384 = vmatmul.mubr.msk.bf16.gmra.mxu1 %vm934_vm2, %v690_v19  ;;  %2414 = vmatpush3.bf16.msra.mxu0 %v2479_v11 }
  0xbd   : > { %v675_v26 = vpack.c.bf16 %v2180_v24, %v2179_v25  ;;  %2387 = vmatprep.mubr.msk.bf16.mxu1 %vm934_vm2, %v691_v21  ;;  %2415 = vmatprep.subr.bf16.mxu0 %v2480_v12 }
  0xbe   : > { %v514_v29 = vpop.permute.xlu1 %513  ;;  %v511_v30 = vpop.permute.xlu0 %510 }
  0xbf   : > { %vm586_vm14 = vcmp.eq.s32.totalorder %v2770_v5, %v514_v29  ;;  %vm585_vm15 = vcmp.eq.s32.totalorder %v2770_v5, %v511_v30  ;;  %2351 = vmatprep.mubr.msk.bf16.mxu0 %vm708_vm5, %v675_v26 }
  0xc0   : > { %v2182_v32 = vsel %vm586_vm14, 1.0, %v2623_v10  ;;  %v2181_v33 = vsel %vm585_vm15, 1.0, %v2623_v10  ;;  %2416 = vmatpush3.bf16.msra.mxu0 %v2480_v12 }
  0xc1   : > { %v676_v35 = vpack.c.bf16 %v2182_v32, %v2181_v33  ;;  %2417 = vmatprep.subr.bf16.mxu0 %v2481_v13 }
  0xc2   : > { %v520_v37 = vpop.permute.xlu1 %519  ;;  %v517_v38 = vpop.permute.xlu0 %516 }
  0xc3   : > { %vm588_vm0 = vcmp.eq.s32.totalorder %v2770_v5, %v520_v37  ;;  %vm587_vm1 = vcmp.eq.s32.totalorder %v2770_v5, %v517_v38  ;;  %2352 = vmatmul.mubr.msk.bf16.gmra.mxu0 %vm708_vm5, %v676_v35 }
  0xc4   : > { %v2184_v39 = vsel %vm588_vm0, 1.0, %v2623_v10  ;;  %v2183_v40 = vsel %vm587_vm1, 1.0, %v2623_v10  ;;  %2388 = vmatmul.mubr.msk.bf16.gmra.mxu1 %vm934_vm2, %v692_v34  ;;  %2418 = vmatpush3.bf16.msra.mxu0 %v2481_v13 }
  0xc5   : > { %v677_v41 = vpack.c.bf16 %v2184_v39, %v2183_v40  ;;  %2391 = vmatprep.mubr.msk.bf16.mxu1 %vm934_vm2, %v693_v36  ;;  %2419 = vmatprep.subr.bf16.mxu0 %v2482_v14 }
  0xc6   : > { %v526_v44 = vpop.permute.xlu1 %525  ;;  %v523_v45 = vpop.permute.xlu0 %522 }
  0xc7   : > { %vm590_vm3 = vcmp.eq.s32.totalorder %v2770_v5, %v526_v44  ;;  %vm589_vm4 = vcmp.eq.s32.totalorder %v2770_v5, %v523_v45  ;;  %2355 = vmatprep.mubr.msk.bf16.mxu0 %vm708_vm5, %v677_v41  ;;  %v399_v5 = vld [vmem:[%s2811_s27 + $0x90] sm:$0xff] }
  0xc8   : > { %v2186_v48 = vsel %vm590_vm3, 1.0, %v2623_v10  ;;  %v2185_v49 = vsel %vm589_vm4, 1.0, %v2623_v10  ;;  %v696_v10 = vpack.c.bf16 %v400_v53, %v399_v5  ;;  %2420 = vmatpush3.bf16.msra.mxu0 %v2482_v14 }
  0xc9   : > { %v678_v51 = vpack.c.bf16 %v2186_v48, %v2185_v49  ;;  %2421 = vmatprep.subr.bf16.mxu0 %v2483_v16 }
  0xca   : > { %v1148_v19 = vpop.permute.xlu0 %1147  ;;  %v1153_v20 = vpop.permute.xlu1 %1152 }
  0xcb   : > { %2356 = vmatmul.mubr.msk.bf16.gmra.mxu0 %vm708_vm5, %v678_v51  ;;  %v1311_v5 = vmul.f32 %v2979_v47, %v1148_v19  ;;  %v1312_v0 = vmul.f32 %v2979_v47, %v1153_v20 }
  0xcc   : > { %2392 = vmatmul.mubr.msk.bf16.gmra.mxu1 %vm934_vm2, %v694_v50  ;;  %2422 = vmatpush3.bf16.msra.mxu0 %v2483_v16 }
  0xcd   : > { %2395 = vmatprep.mubr.msk.bf16.mxu1 %vm934_vm2, %v695_v52  ;;  %2423 = vmatprep.subr.bf16.mxu0 %v2484_v17 }
  0xce   : > { %v1158_v22 = vpop.permute.xlu0 %1157  ;;  %v1163_v25 = vpop.permute.xlu1 %1162 }
  0xcf   : > { %v1313_v55 = vmul.f32 %v2979_v47, %v1158_v22  ;;  %v1314_v57 = vmul.f32 %v2979_v47, %v1163_v25 }
  0xd0   : > { %2424 = vmatpush3.bf16.msra.mxu0 %v2484_v17 }
  0xd1   : > { %2425 = vmatprep.subr.bf16.mxu0 %v2485_v18 }
  0xd2   : > { %v1168_v27 = vpop.permute.xlu0 %1167  ;;  %v2946_v30 = vpop.permute.xlu1 %1172 }
  0xd3   : > { %v1315_v20 = vmul.f32 %v2979_v47, %v1168_v27 }
  0xd4   : > { %2396 = vmatmul.mubr.msk.bf16.gmra.mxu1 %vm934_vm2, %v696_v10  ;;  %2426 = vmatpush3.bf16.msra.mxu0 %v2485_v18 }
  0xd5   : > { %2399 = vmatprep.mubr.msk.bf16.mxu1 %vm934_vm2, %v697_v56 }
  0xd6   : > { %v1178_v31 = vpop.permute.xlu0 %1177  ;;  %v1183_v34 = vpop.permute.xlu1 %1182 }
  0xda   : > { %v2956_v36 = vpop.permute.xlu0 %1187  ;;  %v2962_v39 = vpop.permute.xlu1 %1192 }
  0xdc   : > { %2400 = vmatmul.mubr.msk.bf16.gmra.mxu1 %vm934_vm2, %v698_v61 }
  0xdd   : > { %2403 = vmatprep.mubr.msk.bf16.mxu1 %vm934_vm2, %v699_v62 }
  0xde   : > { %v2966_v41 = vpop.permute.xlu0 %1197  ;;  %v2972_v44 = vpop.permute.xlu1 %1202 }
  0xe2   : > { %v2981_v48 = vpop.permute.xlu0 %1207  ;;  %v2985_v10 = vpop.permute.xlu1 %1212 }
  0xe4   : > { %2404 = vmatmul.mubr.msk.bf16.gmra.mxu1 %vm934_vm2, %v700_v3 }
  0xe5   : > { %2407 = vmatprep.mubr.msk.bf16.mxu1 %vm934_vm2, %v701_v4 }
  0xe6   : > { %v2988_v61 = vpop.permute.xlu0 %1217  ;;  %v2998_v12 = vpop.permute.xlu1 %1222 }
  0xea   : > { %v3003_v22 = vpop.permute.xlu0 %1227 }
  0xec   : > { %2408 = vmatmul.mubr.msk.bf16.gmra.mxu1 %vm934_vm2, %v702_v9 }
 0x154   : > { %v2934_v21 = vpop.f32.mrf.mxu1 }
 0x156   : > { %v2936_v23 = vpop.f32.mrf.mxu1 }
 0x158   : > { %v2938_v24 = vpop.f32.mrf.mxu1 }
 0x15a   : > { %v2940_v26 = vpop.f32.mrf.mxu1 }
 0x15c   : > { %v2942_v28 = vpop.f32.mrf.mxu1 }
 0x15e   : > { %v2944_v29 = vpop.f32.mrf.mxu1 }
 0x160   : > { %v2948_v15 = vpop.f32.mrf.mxu1 }
 0x162   : > { %v2950_v32 = vpop.f32.mrf.mxu1 }
 0x164   : > { %v2952_v33 = vpop.f32.mrf.mxu1 }
 0x166   : > { %v2954_v35 = vpop.f32.mrf.mxu1 }
 0x168   : > { %v2958_v37 = vpop.f32.mrf.mxu1 }
 0x16a   : > { %v2960_v38 = vpop.f32.mrf.mxu1 }
 0x16c   : > { %v2964_v40 = vpop.f32.mrf.mxu1 }
 0x16e   : > { %v2968_v42 = vpop.f32.mrf.mxu1 }
 0x170   : > { %v2970_v43 = vpop.f32.mrf.mxu1 }
 0x172   : > { %v2974_v45 = vpop.f32.mrf.mxu1 }
 0x173   : > { %v2345_v46 = vpop.f32.mrf.mxu0 }
 0x174   : > { %v2381_v49 = vpop.f32.mrf.mxu1 }
 0x175   : > { %v795_v50 = vpop.f32.mrf.mxu0  ;;  %v1026_v51 = vadd.f32 %v2381_v49, %v2345_v46  ;;  %v1317_v49 = vmul.f32 %v2979_v47, %v1178_v31 }
 0x176   : > { %v1017_v52 = vpop.f32.mrf.mxu1 }
 0x177   : > { %v1018_v53 = vadd.f32 %v1017_v52, %v795_v50  ;;  %v2346_v54 = vpop.f32.mrf.mxu0  ;;  %v1345_v62 = vadd.f32 %v1313_v55, %v1026_v51 }
 0x178   : > { %v2382_v56 = vpop.f32.mrf.mxu1 }
 0x179   : > { %v1343_v58 = vadd.f32 %v1311_v5, %v1018_v53  ;;  %v1029_v59 = vadd.f32 %v2382_v56, %v2346_v54  ;;  %v798_v60 = vpop.f32.mrf.mxu0  ;;  %v1384_v13 = vadd.f32 %v2994_v1, %v1345_v62  ;;  %v1318_v5 = vmul.f32 %v2979_v47, %v1183_v34  ;;  %v3009_v62 = vpop.permute.xlu1 %1232 }
 0x17a   : > { %v1020_v63 = vpop.f32.mrf.mxu1  ;;  %v3011_v34 = vpop.permute.xlu0 %1237 }
 0x17b   : > { %v1346_v2 = vadd.f32 %v1314_v57, %v1029_v59  ;;  %v1021_v3 = vadd.f32 %v1020_v63, %v798_v60  ;;  %v2349_v4 = vpop.f32.mrf.mxu0  ;;  %v1382_v7 = vadd.f32 %v2994_v1, %v1343_v58  ;;  %v1416_v53 = vmax.f32 %v1384_v13, 0.0 }
 0x17c   : > { %v2385_v6 = vpop.f32.mrf.mxu1  ;;  %v1316_v57 = vmul.f32 %v2979_v47, %v2946_v30 }
 0x17d   : > { %v1385_v8 = vadd.f32 %v2994_v1, %v1346_v2  ;;  %v1344_v9 = vadd.f32 %v1312_v0, %v1021_v3  ;;  %v811_v11 = vpop.f32.mrf.mxu0  ;;  %v1042_v17 = vadd.f32 %v2385_v6, %v2349_v4  ;;  %v1414_v50 = vmax.f32 %v1382_v7, 0.0 }
 0x17e   : > { %v1033_v14 = vpop.f32.mrf.mxu1 }
 0x17f   : > { %v1383_v16 = vadd.f32 %v2994_v1, %v1344_v9  ;;  %v1034_v18 = vadd.f32 %v1033_v14, %v811_v11  ;;  %v2350_v19 = vpop.f32.mrf.mxu0  ;;  %v1417_v25 = vmax.f32 %v1385_v8, 0.0  ;;  %v1349_v58 = vadd.f32 %v1317_v49, %v1042_v17 }
 0x180   : > { %v2386_v46 = vpop.f32.mrf.mxu1  ;;  %v1319_v14 = vmul.f32 %v2979_v47, %v2956_v36  ;;  %v1320_v49 = vmul.f32 %v2979_v47, %v2962_v39 }
 0x181   : > { %v1415_v51 = vmax.f32 %v1383_v16, 0.0  ;;  %v814_v52 = vpop.f32.mrf.mxu0  ;;  %v1347_v54 = vadd.f32 %v1315_v20, %v1034_v18  ;;  %v1045_v55 = vadd.f32 %v2386_v46, %v2350_v19  ;;  %v1447_v63 = vpack.c.bf16 %v1417_v25, %v1416_v53 }
 0x182   : > { %v1036_v56 = vpop.f32.mrf.mxu1  ;;  %v1388_v30 = vadd.f32 %v2994_v1, %v1349_v58  ;;  %v1322_v16 = vmul.f32 %v2979_v47, %v2972_v44  ;;  %v1321_v18 = vmul.f32 %v2979_v47, %v2966_v41 }
 0x183   : > { %v1037_v27 = vadd.f32 %v1036_v56, %v814_v52  ;;  %v2353_v59 = vpop.f32.mrf.mxu0  ;;  %v1446_v60 = vpack.c.bf16 %v1415_v51, %v1414_v50  ;;  %v1350_v31 = vadd.f32 %v1318_v5, %v1045_v55  ;;  %v1386_v4 = vadd.f32 %v2994_v1, %v1347_v54  ;;  %v1243_v50 = vpop.permute.xlu1 %1242 }
 0x184   : > { %v2389_v0 = vpop.f32.mrf.mxu1  ;;  %v1420_v53 = vmax.f32 %v1388_v30, 0.0  ;;  %v3025_v56 = vpop.permute.xlu0 %1247 }
 0x185   : > { %v1348_v2 = vadd.f32 %v1316_v57, %v1037_v27  ;;  %v827_v3 = vpop.f32.mrf.mxu0  ;;  %2427 = vmatprep.mubr.bf16.mxu0 %v1446_v60  ;;  %v1389_v6 = vadd.f32 %v2994_v1, %v1350_v31  ;;  %v1058_v9 = vadd.f32 %v2389_v0, %v2353_v59  ;;  %v1418_v51 = vmax.f32 %v1386_v4, 0.0 }
 0x186   : > { %v1049_v7 = vpop.f32.mrf.mxu1  ;;  %2428 = vmatmul.mubr.bf16.vlgmr.msra.gmra.mxu0 %v1447_v63 }
 0x187   : > { %v1387_v8 = vadd.f32 %v2994_v1, %v1348_v2  ;;  %v1050_v11 = vadd.f32 %v1049_v7, %v827_v3  ;;  %v2354_v13 = vpop.f32.mrf.mxu0  ;;  %v1421_v19 = vmax.f32 %v1389_v6, 0.0  ;;  %v1353_v36 = vadd.f32 %v1321_v18, %v1058_v9  ;;  %v3035_v30 = vpop.permute.xlu1 %1252 }
 0x188   : > { %v2390_v17 = vpop.f32.mrf.mxu1  ;;  %v1323_v6 = vmul.f32 %v2979_v47, %v2981_v48  ;;  %v1326_v7 = vmul.f32 %v2979_v47, %v2998_v12  ;;  %v1325_v9 = vmul.f32 %v2979_v47, %v2988_v61  ;;  %v1258_v18 = vpop.permute.xlu0 %1257 }
 0x189   : > { %v1419_v20 = vmax.f32 %v1387_v8, 0.0  ;;  %v1061_v25 = vadd.f32 %v2390_v17, %v2354_v13  ;;  %v830_v46 = vpop.f32.mrf.mxu0  ;;  %v1351_v52 = vadd.f32 %v1319_v14, %v1050_v11  ;;  %v1449_v60 = vpack.c.bf16 %v1421_v19, %v1420_v53 }
 0x18a   : > { %v1052_v5 = vpop.f32.mrf.mxu1  ;;  %v1392_v31 = vadd.f32 %v2994_v1, %v1353_v36  ;;  %v1324_v17 = vmul.f32 %v2979_v47, %v2985_v10 }
 0x18b   : > { %v1354_v54 = vadd.f32 %v1322_v16, %v1061_v25  ;;  %v1053_v55 = vadd.f32 %v1052_v5, %v830_v46  ;;  %v2357_v44 = vpop.f32.mrf.mxu0  ;;  %v1448_v41 = vpack.c.bf16 %v1419_v20, %v1418_v51  ;;  %v1390_v39 = vadd.f32 %v2994_v1, %v1351_v52  ;;  %v1263_v10 = vpop.permute.xlu1 %1262 }
 0x18c   : > { %v2393_v57 = vpop.f32.mrf.mxu1  ;;  %v1424_v25 = vmax.f32 %v1392_v31, 0.0 }
 0x18d   : > { %v1393_v58 = vadd.f32 %v2994_v1, %v1354_v54  ;;  %v1352_v27 = vadd.f32 %v1320_v49, %v1053_v55  ;;  %v843_v59 = vpop.f32.mrf.mxu0  ;;  %2431 = vmatprep.mubr.bf16.mxu0 %v1448_v41  ;;  %v1074_v2 = vadd.f32 %v2393_v57, %v2357_v44  ;;  %v1422_v19 = vmax.f32 %v1390_v39, 0.0 }
 0x18e   : > { %v1065_v63 = vpop.f32.mrf.mxu1  ;;  %2432 = vmatmul.mubr.bf16.gmra.mxu0 %v1449_v60  ;;  %v1329_v54 = vmul.f32 %v2979_v47, %v3011_v34  ;;  %v1330_v34 = vmul.f32 %v2979_v47, %v1243_v50 }
 0x18f   : > { %v1391_v0 = vadd.f32 %v2994_v1, %v1352_v27  ;;  %v1066_v3 = vadd.f32 %v1065_v63, %v843_v59  ;;  %v2358_v4 = vpop.f32.mrf.mxu0  ;;  %v1425_v11 = vmax.f32 %v1393_v58, 0.0  ;;  %v1357_v46 = vadd.f32 %v1325_v9, %v1074_v2 }
 0x190   : > { %v2394_v8 = vpop.f32.mrf.mxu1  ;;  %v1327_v27 = vmul.f32 %v2979_v47, %v3003_v22  ;;  %v1273_v22 = vpop.permute.xlu1 %1272 }
 0x191   : > { %v1423_v13 = vmax.f32 %v1391_v0, 0.0  ;;  %v1077_v14 = vadd.f32 %v2394_v8, %v2358_v4  ;;  %v846_v16 = vpop.f32.mrf.mxu0  ;;  %v1355_v20 = vadd.f32 %v1323_v6, %v1066_v3  ;;  %v1451_v36 = vpack.c.bf16 %v1425_v11, %v1424_v25 }
 0x192   : > { %v1068_v48 = vpop.f32.mrf.mxu1  ;;  %v1396_v57 = vadd.f32 %v2994_v1, %v1357_v46  ;;  %v1328_v4 = vmul.f32 %v2979_v47, %v3009_v62  ;;  %v1331_v25 = vmul.f32 %v2979_v47, %v3025_v56 }
 0x193   : > { %v1358_v12 = vadd.f32 %v1326_v7, %v1077_v14  ;;  %v1069_v49 = vadd.f32 %v1068_v48, %v846_v16  ;;  %v1450_v52 = vpack.c.bf16 %v1423_v13, %v1422_v19  ;;  %v1394_v55 = vadd.f32 %v2994_v1, %v1355_v20 }
 0x194   : > { %v2397_v51 = vpop.f32.mrf.mxu1  ;;  %v1333_v16 = vmul.f32 %v2979_v47, %v1258_v18 }
 0x195   : > { %v1397_v5 = vadd.f32 %v2994_v1, %v1358_v12  ;;  %v1356_v61 = vadd.f32 %v1324_v17, %v1069_v49  ;;  %v1090_v53 = vadd.f32 %v2397_v51, %v2934_v21  ;;  %2435 = vmatprep.mubr.bf16.mxu0 %v1450_v52  ;;  %v1268_v21 = vpop.permute.xlu0 %1267  ;;  %v1426_v0 = vmax.f32 %v1394_v55, 0.0  ;;  %v1283_v52 = vpop.permute.xlu1 %1282 }
 0x196   : > { %v1081_v44 = vpop.f32.mrf.mxu1  ;;  %2436 = vmatmul.mubr.bf16.gmra.mxu0 %v1451_v36  ;;  %v1334_v49 = vmul.f32 %v2979_v47, %v1263_v10 }
 0x197   : > { %v1395_v41 = vadd.f32 %v2994_v1, %v1356_v61  ;;  %v1082_v58 = vadd.f32 %v1081_v44, %v2936_v23  ;;  %v1361_v59 = vadd.f32 %v1329_v54, %v1090_v53  ;;  %v1429_v39 = vmax.f32 %v1397_v5, 0.0 }
 0x198   : > { %v2398_v60 = vpop.f32.mrf.mxu1  ;;  %v1428_v23 = vmax.f32 %v1396_v57, 0.0 }
 0x199   : > { %v1427_v63 = vmax.f32 %v1395_v41, 0.0  ;;  %v1093_v31 = vadd.f32 %v2398_v60, %v2938_v24  ;;  %v1359_v2 = vadd.f32 %v1327_v27, %v1082_v58  ;;  %v1400_v8 = vadd.f32 %v2994_v1, %v1361_v59  ;;  %v1278_v17 = vpop.permute.xlu0 %1277 }
 0x19a   : > { %v1084_v3 = vpop.f32.mrf.mxu1  ;;  %v1453_v14 = vpack.c.bf16 %v1429_v39, %v1428_v23  ;;  %v1337_v27 = vmul.f32 %v2979_v47, %v1278_v17  ;;  %v1335_v39 = vmul.f32 %v2979_v47, %v1268_v21 }
 0x19b   : > { %v1362_v6 = vadd.f32 %v1330_v34, %v1093_v31  ;;  %v1085_v7 = vadd.f32 %v1084_v3, %v2940_v26  ;;  %v1452_v11 = vpack.c.bf16 %v1427_v63, %v1426_v0  ;;  %v1398_v62 = vadd.f32 %v2994_v1, %v1359_v2  ;;  %v1293_v63 = vpop.permute.xlu1 %1292 }
 0x19c   : > { %v2401_v9 = vpop.f32.mrf.mxu1  ;;  %v1432_v46 = vmax.f32 %v1400_v8, 0.0 }
 0x19d   : > { %v1401_v50 = vadd.f32 %v2994_v1, %v1362_v6  ;;  %v1360_v13 = vadd.f32 %v1328_v4, %v1085_v7  ;;  %v1106_v24 = vadd.f32 %v2401_v9, %v2942_v28  ;;  %2439 = vmatprep.mubr.bf16.mxu0 %v1452_v11  ;;  %v1430_v5 = vmax.f32 %v1398_v62, 0.0  ;;  %v1288_v56 = vpop.permute.xlu0 %1287 }
 0x19e   : > { %v1097_v19 = vpop.f32.mrf.mxu1  ;;  %2440 = vmatmul.mubr.bf16.gmra.mxu0 %v1453_v14  ;;  %v1336_v11 = vmul.f32 %v2979_v47, %v1273_v22  ;;  %v1339_v62 = vmul.f32 %v2979_v47, %v1288_v56 }
 0x19f   : > { %v1433_v20 = vmax.f32 %v1401_v50, 0.0  ;;  %v1399_v26 = vadd.f32 %v2994_v1, %v1360_v13  ;;  %v1098_v48 = vadd.f32 %v1097_v19, %v2944_v29  ;;  %v1365_v12 = vadd.f32 %v1333_v16, %v1106_v24  ;;  %v1303_v19 = vpop.permute.xlu1 %1302 }
 0x1a0   : > { %v2402_v28 = vpop.f32.mrf.mxu1  ;;  %v1332_v29 = vmul.f32 %v2979_v47, %v3035_v30 }
 0x1a1   : > { %v1431_v18 = vmax.f32 %v1399_v26, 0.0  ;;  %v1109_v51 = vadd.f32 %v2402_v28, %v2948_v15  ;;  %v1363_v61 = vadd.f32 %v1331_v25, %v1098_v48  ;;  %v1455_v36 = vpack.c.bf16 %v1433_v20, %v1432_v46  ;;  %v1298_v23 = vpop.permute.xlu0 %1297 }
 0x1a2   : > { %v1100_v53 = vpop.f32.mrf.mxu1  ;;  %v1404_v44 = vadd.f32 %v2994_v1, %v1365_v12  ;;  %v1341_v14 = vmul.f32 %v2979_v47, %v1298_v23  ;;  %v1342_v28 = vmul.f32 %v2979_v47, %v1303_v19 }
 0x1a3   : > { %v1366_v54 = vadd.f32 %v1334_v49, %v1109_v51  ;;  %v1101_v55 = vadd.f32 %v1100_v53, %v2950_v32  ;;  %v1454_v41 = vpack.c.bf16 %v1431_v18, %v1430_v5  ;;  %v1402_v59 = vadd.f32 %v2994_v1, %v1363_v61 }
 0x1a4   : > { %v2405_v57 = vpop.f32.mrf.mxu1  ;;  %v1436_v31 = vmax.f32 %v1404_v44, 0.0  ;;  %v1340_v61 = vmul.f32 %v2979_v47, %v1293_v63 }
 0x1a5   : > { %v1405_v10 = vadd.f32 %v2994_v1, %v1366_v54  ;;  %v1364_v58 = vadd.f32 %v1332_v29, %v1101_v55  ;;  %v1122_v15 = vadd.f32 %v2405_v57, %v2952_v33  ;;  %2443 = vmatprep.mubr.bf16.mxu0 %v1454_v41  ;;  %v1338_v33 = vmul.f32 %v2979_v47, %v1283_v52 }
 0x1a6   : > { %v1113_v60 = vpop.f32.mrf.mxu1  ;;  %2444 = vmatmul.mubr.bf16.gmra.mxu0 %v1455_v36  ;;  %v1434_v6 = vmax.f32 %v1402_v59, 0.0 }
 0x1a7   : > { %v1437_v30 = vmax.f32 %v1405_v10, 0.0  ;;  %v1403_v34 = vadd.f32 %v2994_v1, %v1364_v58  ;;  %v1114_v32 = vadd.f32 %v1113_v60, %v2954_v35  ;;  %v1369_v0 = vadd.f32 %v1337_v27, %v1122_v15 }
 0x1a8   : > { %v2406_v2 = vpop.f32.mrf.mxu1 }
 0x1a9   : > { %v1435_v3 = vmax.f32 %v1403_v34, 0.0  ;;  %v1125_v4 = vadd.f32 %v2406_v2, %v2958_v37  ;;  %v1367_v7 = vadd.f32 %v1335_v39, %v1114_v32  ;;  %v1457_v9 = vpack.c.bf16 %v1437_v30, %v1436_v31 }
 0x1aa   : > { %v1116_v8 = vpop.f32.mrf.mxu1  ;;  %v1408_v21 = vadd.f32 %v2994_v1, %v1369_v0 }
 0x1ab   : > { %v1370_v35 = vadd.f32 %v1338_v33, %v1125_v4  ;;  %v1117_v50 = vadd.f32 %v1116_v8, %v2960_v38  ;;  %v1456_v24 = vpack.c.bf16 %v1435_v3, %v1434_v6  ;;  %v1406_v20 = vadd.f32 %v2994_v1, %v1367_v7 }
 0x1ac   : > { %v2409_v13 = vpop.f32.mrf.mxu1  ;;  %v1440_v46 = vmax.f32 %v1408_v21, 0.0 }
 0x1ad   : > { %v1409_v16 = vadd.f32 %v2994_v1, %v1370_v35  ;;  %v1368_v17 = vadd.f32 %v1336_v11, %v1117_v50  ;;  %v1138_v37 = vadd.f32 %v2409_v13, %v2964_v40  ;;  %2447 = vmatprep.mubr.bf16.mxu0 %v1456_v24  ;;  %v1438_v51 = vmax.f32 %v1406_v20, 0.0 }
 0x1ae   : > { %v1129_v22 = vpop.f32.mrf.mxu1  ;;  %2448 = vmatmul.mubr.bf16.gmra.mxu0 %v1457_v9 }
 0x1af   : > { %v1441_v26 = vmax.f32 %v1409_v16, 0.0  ;;  %v1407_v38 = vadd.f32 %v2994_v1, %v1368_v17  ;;  %v1373_v48 = vadd.f32 %v1341_v14, %v1138_v37  ;;  %v1130_v25 = vadd.f32 %v1129_v22, %v2968_v42 }
 0x1b0   : > { %v2410_v12 = vpop.f32.mrf.mxu1 }
 0x1b1   : > { %v1439_v49 = vmax.f32 %v1407_v38, 0.0  ;;  %v1371_v40 = vadd.f32 %v1339_v62, %v1130_v25  ;;  %v1141_v18 = vadd.f32 %v2410_v12, %v2970_v43  ;;  %v1459_v5 = vpack.c.bf16 %v1441_v26, %v1440_v46 }
 0x1b2   : > { %v1132_v52 = vpop.f32.mrf.mxu1  ;;  %v1412_v53 = vadd.f32 %v2994_v1, %v1373_v48 }
 0x1b3   : > { %v1374_v36 = vadd.f32 %v1342_v28, %v1141_v18  ;;  %v1133_v29 = vadd.f32 %v1132_v52, %v2974_v45  ;;  %v1458_v42 = vpack.c.bf16 %v1439_v49, %v1438_v51  ;;  %v1410_v54 = vadd.f32 %v2994_v1, %v1371_v40  ;;  %v3101_v45 = vld [vmem:[%s3376_s8] ss:$0 sm:$0xff] }
 0x1b4   : > { %v1444_v44 = vmax.f32 %v1412_v53, 0.0 }
 0x1b5   : > { %v1413_v55 = vadd.f32 %v2994_v1, %v1374_v36  ;;  %v1372_v56 = vadd.f32 %v1340_v61, %v1133_v29  ;;  %2451 = vmatprep.mubr.bf16.mxu0 %v1458_v42  ;;  %v1442_v41 = vmax.f32 %v1410_v54, 0.0 }
 0x1b6   : > { %2452 = vmatmul.mubr.bf16.gmra.mxu0 %v1459_v5 }
 0x1b7   : > { %v1445_v57 = vmax.f32 %v1413_v55, 0.0  ;;  %v1411_v43 = vadd.f32 %v2994_v1, %v1372_v56 }
 0x1b9   : > { %v1443_v10 = vmax.f32 %v1411_v43, 0.0  ;;  %v1461_v47 = vpack.c.bf16 %v1445_v57, %v1444_v44 }
 0x1bb   : > { %v1460_v58 = vpack.c.bf16 %v1443_v10, %v1442_v41 }
 0x1bd   : > { %2455 = vmatprep.mubr.bf16.mxu0 %v1460_v58 }
 0x1be   : > { %2456 = vmatmul.mubr.bf16.gmra.mxu0 %v1461_v47 }
 0x246   : > { %v2429_v15 = vpop.f32.mrf.mxu0 }
 0x247   : > { %v3104_v27 = vadd.f32 %v2429_v15, %v3101_v45 }
 0x248   : > { %v1567_v59 = vpop.f32.mrf.mxu0 }
 0x249   : > { %v2250_v60 = vmul.f32 -1.442695, %v3104_v27  ;;  %v3108_v1 = vadd.f32 %v3101_v45, %v1567_v59 }
 0x24a   : > { %v2430_v30 = vpop.f32.mrf.mxu0 }
 0x24b   : > { %2486 = vpow2.f32 %v2250_v60  ;;  %v2248_v34 = vmul.f32 -1.442695, %v3108_v1  ;;  %v3112_v32 = vadd.f32 %v2430_v30, %v3101_v45 }
 0x24c   : > { %v1570_v39 = vpop.f32.mrf.mxu0 }
 0x24d   : > { %2488 = vpow2.f32 %v2248_v34  ;;  %v2251_v63 = vmul.f32 -1.442695, %v3112_v32  ;;  %v3116_v31 = vadd.f32 %v3101_v45, %v1570_v39 }
 0x24e   : > { %v2433_v2 = vpop.f32.mrf.mxu0 }
 0x24f   : > { %2490 = vpow2.f32 %v2251_v63  ;;  %v2249_v0 = vmul.f32 -1.442695, %v3116_v31  ;;  %v3120_v33 = vadd.f32 %v2433_v2, %v3101_v45 }
 0x250   : > { %v1583_v3 = vpop.f32.mrf.mxu0 }
 0x251   : > { %2492 = vpow2.f32 %v2249_v0  ;;  %v2254_v4 = vmul.f32 -1.442695, %v3120_v33  ;;  %v3124_v23 = vadd.f32 %v3101_v45, %v1583_v3 }
 0x252   : > { %v2434_v6 = vpop.f32.mrf.mxu0 }
 0x253   : > { %2494 = vpow2.f32 %v2254_v4  ;;  %v2252_v7 = vmul.f32 -1.442695, %v3124_v23  ;;  %v3128_v8 = vadd.f32 %v2434_v6, %v3101_v45 }
 0x254   : > { %v1586_v9 = vpop.f32.mrf.mxu0 }
 0x255   : > { %2496 = vpow2.f32 %v2252_v7  ;;  %v2255_v11 = vmul.f32 -1.442695, %v3128_v8  ;;  %v3132_v35 = vadd.f32 %v3101_v45, %v1586_v9 }
 0x256   : > { %v2437_v50 = vpop.f32.mrf.mxu0 }
 0x257   : > { %2498 = vpow2.f32 %v2255_v11  ;;  %v2253_v13 = vmul.f32 -1.442695, %v3132_v35  ;;  %v3136_v24 = vadd.f32 %v2437_v50, %v3101_v45 }
 0x258   : > { %v2487_v21 = vpop.eup %2486  ;;  %v1599_v16 = vpop.f32.mrf.mxu0 }
 0x259   : > { %v1792_v14 = vadd.f32 1.0, %v2487_v21  ;;  %2500 = vpow2.f32 %v2253_v13  ;;  %v2258_v37 = vmul.f32 -1.442695, %v3136_v24  ;;  %v3140_v62 = vadd.f32 %v3101_v45, %v1599_v16 }
 0x25a   : > { %v2489_v17 = vpop.eup %2488  ;;  %v2438_v20 = vpop.f32.mrf.mxu0 }
 0x25b   : > { %2502 = vrcp.f32 %v1792_v14  ;;  %v1790_v19 = vadd.f32 1.0, %v2489_v17  ;;  %v2256_v26 = vmul.f32 -1.442695, %v3140_v62  ;;  %v3144_v38 = vadd.f32 %v2438_v20, %v3101_v45 }
 0x25c   : > { %v2491_v22 = vpop.eup %2490  ;;  %2504 = vpow2.f32 %v2258_v37  ;;  %v1602_v25 = vpop.f32.mrf.mxu0 }
 0x25d   : > { %2506 = vrcp.f32 %v1790_v19  ;;  %v1793_v48 = vadd.f32 1.0, %v2491_v22  ;;  %v2259_v12 = vmul.f32 -1.442695, %v3144_v38  ;;  %v3148_v28 = vadd.f32 %v3101_v45, %v1602_v25 }
 0x25e   : > { %v2493_v46 = vpop.eup %2492  ;;  %2508 = vpow2.f32 %v2256_v26  ;;  %v2441_v40 = vpop.f32.mrf.mxu0 }
 0x25f   : > { %2510 = vrcp.f32 %v1793_v48  ;;  %v1791_v49 = vadd.f32 1.0, %v2493_v46  ;;  %v2257_v18 = vmul.f32 -1.442695, %v3148_v28  ;;  %v3152_v51 = vadd.f32 %v2441_v40, %v3101_v45 }
 0x260   : > { %2512 = vpow2.f32 %v2259_v12  ;;  %v2495_v52 = vpop.eup %2494  ;;  %v1615_v5 = vpop.f32.mrf.mxu0 }
 0x261   : > { %v1796_v61 = vadd.f32 1.0, %v2495_v52  ;;  %2514 = vpow2.f32 %v2257_v18  ;;  %v2262_v53 = vmul.f32 -1.442695, %v3152_v51  ;;  %v3156_v36 = vadd.f32 %v3101_v45, %v1615_v5 }
 0x262   : > { %v2497_v29 = vpop.eup %2496  ;;  %2516 = vrcp.f32 %v1791_v49  ;;  %v2442_v42 = vpop.f32.mrf.mxu0 }
 0x263   : > { %2518 = vrcp.f32 %v1796_v61  ;;  %v1794_v54 = vadd.f32 1.0, %v2497_v29  ;;  %v2260_v55 = vmul.f32 -1.442695, %v3156_v36  ;;  %v3160_v56 = vadd.f32 %v2442_v42, %v3101_v45 }
 0x264   : > { %v2499_v44 = vpop.eup %2498  ;;  %2520 = vpow2.f32 %v2262_v53  ;;  %v1618_v57 = vpop.f32.mrf.mxu0 }
 0x265   : > { %2522 = vrcp.f32 %v1794_v54  ;;  %v1797_v43 = vadd.f32 1.0, %v2499_v44  ;;  %v2263_v41 = vmul.f32 -1.442695, %v3160_v56  ;;  %v3164_v10 = vadd.f32 %v3101_v45, %v1618_v57 }
 0x266   : > { %v2501_v47 = vpop.eup %2500  ;;  %2524 = vpow2.f32 %v2260_v55  ;;  %v2445_v58 = vpop.f32.mrf.mxu0 }
 0x267   : > { %2526 = vrcp.f32 %v1797_v43  ;;  %v1795_v59 = vadd.f32 1.0, %v2501_v47  ;;  %v2261_v60 = vmul.f32 -1.442695, %v3164_v10  ;;  %v3168_v30 = vadd.f32 %v2445_v58, %v3101_v45 }
 0x268   : > { %v2503_v15 = vpop.eup %2502  ;;  %2528 = vpow2.f32 %v2263_v41  ;;  %v1631_v39 = vpop.f32.mrf.mxu0 }
 0x269   : > { %v2505_v34 = vpop.eup %2504  ;;  %1922 = vrot.lane.b32.xlu0 %v2503_v15, %s2624_s11  ;;  %2530 = vrcp.f32 %v1795_v59  ;;  %v2266_v2 = vmul.f32 -1.442695, %v3168_v30  ;;  %v3173_v3 = vadd.f32 %v3101_v45, %v1631_v39 }
 0x26a   : > { %v2507_v63 = vpop.eup %2506  ;;  %v1800_v0 = vadd.f32 1.0, %v2505_v34  ;;  %2532 = vpow2.f32 %v2261_v60  ;;  %v2446_v6 = vpop.f32.mrf.mxu0 }
 0x26b   : > { %v2509_v4 = vpop.eup %2508  ;;  %v2264_v11 = vmul.f32 -1.442695, %v3173_v3  ;;  %v3177_v50 = vadd.f32 %v2446_v6, %v3101_v45 }
 0x26c   : > { %v2511_v7 = vpop.eup %2510  ;;  %2534 = vrcp.f32 %v1800_v0  ;;  %v1798_v9 = vadd.f32 1.0, %v2509_v4  ;;  %v1634_v13 = vpop.f32.mrf.mxu0 }
 0x26d   : > { %v2513_v21 = vpop.eup %2512  ;;  %2536 = vpow2.f32 %v2266_v2  ;;  %1924 = vrot.lane.b32.xlu1 %v2511_v7, %s2624_s11  ;;  %1918 = vrot.lane.b32.xlu0 %v2507_v63, %s2624_s11  ;;  %v2267_v16 = vmul.f32 -1.442695, %v3177_v50  ;;  %v3183_v17 = vadd.f32 %v3101_v45, %v1634_v13 }
 0x26e   : > { %2538 = vrcp.f32 %v1798_v9  ;;  %v1801_v14 = vadd.f32 1.0, %v2513_v21  ;;  %v2515_v37 = vpop.eup %2514  ;;  %v2449_v19 = vpop.f32.mrf.mxu0 }
 0x26f   : > { %2540 = vpow2.f32 %v2264_v11  ;;  %v2517_v20 = vpop.eup %2516  ;;  %v1799_v22 = vadd.f32 1.0, %v2515_v37  ;;  %v2265_v26 = vmul.f32 -1.442695, %v3183_v17  ;;  %v3187_v48 = vadd.f32 %v2449_v19, %v3101_v45 }
 0x270   : > { %2542 = vrcp.f32 %v1801_v14  ;;  %v2519_v25 = vpop.eup %2518  ;;  %v1647_v46 = vpop.f32.mrf.mxu0 }
 0x271   : > { %2544 = vpow2.f32 %v2267_v16  ;;  %1920 = vrot.lane.b32.xlu1 %v2517_v20, %s2624_s11  ;;  %v2521_v12 = vpop.eup %2520  ;;  %v2270_v49 = vmul.f32 -1.442695, %v3187_v48  ;;  %v3192_v40 = vadd.f32 %v3101_v45, %v1647_v46  ;;  %1930 = vrot.lane.b32.xlu0 %v2519_v25, %s2624_s11 }
 0x272   : > { %2546 = vrcp.f32 %v1799_v22  ;;  %v2523_v18 = vpop.eup %2522  ;;  %v1804_v52 = vadd.f32 1.0, %v2521_v12  ;;  %v2450_v5 = vpop.f32.mrf.mxu0 }
 0x273   : > { %2548 = vpow2.f32 %v2265_v26  ;;  %v2525_v61 = vpop.eup %2524  ;;  %v2268_v53 = vmul.f32 -1.442695, %v3192_v40  ;;  %v3197_v29 = vadd.f32 %v2450_v5, %v3101_v45 }
 0x274   : > { %2550 = vpow2.f32 %v2270_v49  ;;  %v2527_v42 = vpop.eup %2526  ;;  %v1802_v54 = vadd.f32 1.0, %v2525_v61  ;;  %v1650_v55 = vpop.f32.mrf.mxu0 }
 0x275   : > { %2552 = vrcp.f32 %v1804_v52  ;;  %v2529_v44 = vpop.eup %2528  ;;  %v2271_v57 = vmul.f32 -1.442695, %v3197_v29  ;;  %v3201_v43 = vadd.f32 %v3101_v45, %v1650_v55  ;;  %1932 = vrot.lane.b32.xlu1 %v2527_v42, %s2624_s11  ;;  %1926 = vrot.lane.b32.xlu0 %v2523_v18, %s2624_s11 }
 0x276   : > { %2554 = vpow2.f32 %v2268_v53  ;;  %v2531_v41 = vpop.eup %2530  ;;  %v1805_v47 = vadd.f32 1.0, %v2529_v44  ;;  %v2453_v58 = vpop.f32.mrf.mxu0 }
 0x277   : > { %2556 = vrcp.f32 %v1802_v54  ;;  %v2533_v15 = vpop.eup %2532  ;;  %v2269_v59 = vmul.f32 -1.442695, %v3201_v43  ;;  %v3207_v60 = vadd.f32 %v2453_v58, %v3101_v45 }
 0x278   : > { %2558 = vpow2.f32 %v2271_v57  ;;  %v1803_v39 = vadd.f32 1.0, %v2533_v15  ;;  %v1663_v63 = vpop.f32.mrf.mxu0 }
 0x279   : > { %v2535_v34 = vpop.eup %2534  ;;  %2560 = vrcp.f32 %v1805_v47  ;;  %v2274_v2 = vmul.f32 -1.442695, %v3207_v60  ;;  %v3211_v4 = vadd.f32 %v3101_v45, %v1663_v63  ;;  %1928 = vrot.lane.b32.xlu1 %v2531_v41, %s2624_s11 }
 0x27a   : > { %v2537_v0 = vpop.eup %2536  ;;  %2562 = vpow2.f32 %v2269_v59  ;;  %1938 = vrot.lane.b32.xlu0 %v2535_v34, %s2624_s11  ;;  %v2454_v9 = vpop.f32.mrf.mxu0 }
 0x27b   : > { %v2539_v6 = vpop.eup %2538  ;;  %2564 = vrcp.f32 %v1803_v39  ;;  %v1808_v7 = vadd.f32 1.0, %v2537_v0  ;;  %v2272_v21 = vmul.f32 -1.442695, %v3211_v4  ;;  %v3217_v13 = vadd.f32 %v2454_v9, %v3101_v45 }
 0x27c   : > { %v2541_v11 = vpop.eup %2540  ;;  %2566 = vpow2.f32 %v2274_v2  ;;  %v1666_v37 = vpop.f32.mrf.mxu0 }
 0x27d   : > { %v2543_v14 = vpop.eup %2542  ;;  %2568 = vrcp.f32 %v1808_v7  ;;  %v1806_v16 = vadd.f32 1.0, %v2541_v11  ;;  %v2275_v20 = vmul.f32 -1.442695, %v3217_v13  ;;  %v3221_v22 = vadd.f32 %v3101_v45, %v1666_v37 }
 0x27e   : > { %v2545_v19 = vpop.eup %2544  ;;  %2570 = vpow2.f32 %v2272_v21  ;;  %1940 = vrot.lane.b32.xlu1 %v2543_v14, %s2624_s11  ;;  %1934 = vrot.lane.b32.xlu0 %v2539_v6, %s2624_s11  ;;  %v2457_v46 = vpop.f32.mrf.mxu0 }
 0x27f   : > { %v2547_v26 = vpop.eup %2546  ;;  %2572 = vrcp.f32 %v1806_v16  ;;  %v1809_v25 = vadd.f32 1.0, %v2545_v19  ;;  %v2273_v49 = vmul.f32 -1.442695, %v3221_v22  ;;  %v3227_v18 = vadd.f32 %v2457_v46, %v3101_v45 }
 0x280   : > { %v2549_v12 = vpop.eup %2548  ;;  %2574 = vpow2.f32 %v2275_v20  ;;  %v1679_v61 = vpop.f32.mrf.mxu0 }
 0x281   : > { %v2551_v52 = vpop.eup %2550  ;;  %2576 = vrcp.f32 %v1809_v25  ;;  %v1807_v5 = vadd.f32 1.0, %v2549_v12  ;;  %v2278_v54 = vmul.f32 -1.442695, %v3227_v18  ;;  %v3231_v55 = vadd.f32 %v3101_v45, %v1679_v61 }
 0x282   : > { %v2553_v53 = vpop.eup %2552  ;;  %v1812_v42 = vadd.f32 1.0, %v2551_v52  ;;  %2578 = vpow2.f32 %v2273_v49  ;;  %1936 = vrot.lane.b32.xlu1 %v2547_v26, %s2624_s11  ;;  %v2458_v57 = vpop.f32.mrf.mxu0 }
 0x283   : > { %v2555_v44 = vpop.eup %2554  ;;  %1946 = vrot.lane.b32.xlu0 %v2553_v53, %s2624_s11  ;;  %v2276_v47 = vmul.f32 -1.442695, %v3231_v55  ;;  %v3237_v58 = vadd.f32 %v2458_v57, %v3101_v45 }
 0x284   : > { %v2557_v41 = vpop.eup %2556  ;;  %2580 = vrcp.f32 %v1812_v42  ;;  %v1810_v59 = vadd.f32 1.0, %v2555_v44  ;;  %v1682_v34 = vpop.f32.mrf.mxu0 }
 0x285   : > { %v2559_v15 = vpop.eup %2558  ;;  %2582 = vrcp.f32 %v1807_v5  ;;  %v2279_v0 = vmul.f32 -1.442695, %v3237_v58  ;;  %v3241_v2 = vadd.f32 %v3101_v45, %v1682_v34 }
 0x286   : > { %v2561_v39 = vpop.eup %2560  ;;  %v1813_v63 = vadd.f32 1.0, %v2559_v15  ;;  %2584 = vpow2.f32 %v2278_v54 }
 0x287   : > { %v2563_v6 = vpop.eup %2562  ;;  %2586 = vpow2.f32 %v2276_v47  ;;  %1948 = vrot.lane.b32.xlu1 %v2561_v39, %s2624_s11  ;;  %1942 = vrot.lane.b32.xlu0 %v2557_v41, %s2624_s11  ;;  %v2277_v9 = vmul.f32 -1.442695, %v3241_v2 }
 0x288   : > { %v2565_v7 = vpop.eup %2564  ;;  %2588 = vrcp.f32 %v1813_v63  ;;  %v1811_v21 = vadd.f32 1.0, %v2563_v6 }
 0x289   : > { %v2567_v11 = vpop.eup %2566  ;;  %2590 = vrcp.f32 %v1810_v59 }
 0x28a   : > { %v2569_v14 = vpop.eup %2568  ;;  %v1816_v16 = vadd.f32 1.0, %v2567_v11  ;;  %2592 = vpow2.f32 %v2279_v0 }
 0x28b   : > { %v2571_v37 = vpop.eup %2570  ;;  %2594 = vpow2.f32 %v2277_v9  ;;  %1944 = vrot.lane.b32.xlu1 %v2565_v7, %s2624_s11  ;;  %1954 = vrot.lane.b32.xlu0 %v2569_v14, %s2624_s11 }
 0x28c   : > { %v2573_v45 = vpop.eup %2572  ;;  %2596 = vrcp.f32 %v1816_v16  ;;  %v1814_v20 = vadd.f32 1.0, %v2571_v37 }
 0x28d   : > { %v2575_v19 = vpop.eup %2574  ;;  %2598 = vrcp.f32 %v1811_v21 }
 0x28e   : > { %v2577_v26 = vpop.eup %2576  ;;  %v1817_v25 = vadd.f32 1.0, %v2575_v19 }
 0x28f   : > { %v2579_v46 = vpop.eup %2578  ;;  %1956 = vrot.lane.b32.xlu1 %v2577_v26, %s2624_s11  ;;  %1950 = vrot.lane.b32.xlu0 %v2573_v45, %s2624_s11 }
 0x290   : > { %2600 = vrcp.f32 %v1817_v25  ;;  %v1815_v49 = vadd.f32 1.0, %v2579_v46 }
 0x291   : > { %v2581_v12 = vpop.eup %2580  ;;  %2602 = vrcp.f32 %v1814_v20 }
 0x292   : > { %v2583_v52 = vpop.eup %2582  ;;  %2604 = vrcp.f32 %v1815_v49 }
 0x293   : > { %v2585_v5 = vpop.eup %2584  ;;  %1952 = vrot.lane.b32.xlu1 %v2583_v52, %s2624_s11  ;;  %1962 = vrot.lane.b32.xlu0 %v2581_v12, %s2624_s11 }
 0x294   : > { %v2587_v61 = vpop.eup %2586  ;;  %v1820_v44 = vadd.f32 1.0, %v2585_v5 }
 0x295   : > { %v2589_v53 = vpop.eup %2588  ;;  %v1818_v42 = vadd.f32 1.0, %v2587_v61 }
 0x296   : > { %v2591_v54 = vpop.eup %2590 }
 0x297   : > { %v2593_v57 = vpop.eup %2592  ;;  %2606 = vrcp.f32 %v1818_v42  ;;  %1964 = vrot.lane.b32.xlu1 %v2589_v53, %s2624_s11  ;;  %1958 = vrot.lane.b32.xlu0 %v2591_v54, %s2624_s11 }
 0x298   : > { %v2595_v41 = vpop.eup %2594  ;;  %2608 = vrcp.f32 %v1820_v44  ;;  %v1821_v34 = vadd.f32 1.0, %v2593_v57 }
 0x299   : > { %v2597_v47 = vpop.eup %2596  ;;  %v1819_v15 = vadd.f32 1.0, %v2595_v41 }
 0x29a   : > { %v2599_v59 = vpop.eup %2598 }
 0x29b   : > { %2610 = vrcp.f32 %v1819_v15  ;;  %1960 = vrot.lane.b32.xlu1 %v2599_v59, %s2624_s11  ;;  %1970 = vrot.lane.b32.xlu0 %v2597_v47, %s2624_s11 }
 0x29c   : > { %2612 = vrcp.f32 %v1821_v34 }
 0x29d   : > { %v2601_v39 = vpop.eup %2600 }
 0x29e   : > { %v2603_v63 = vpop.eup %2602 }
 0x29f   : > { %1972 = vrot.lane.b32.xlu1 %v2601_v39, %s2624_s11  ;;  %1966 = vrot.lane.b32.xlu0 %v2603_v63, %s2624_s11  ;;  %v2605_v0 = vpop.eup %2604 }
 0x2a3   : > { %1968 = vrot.lane.b32.xlu1 %v2605_v0, %s2624_s11 }
 0x2a4   : > { %v2607_v6 = vpop.eup %2606 }
 0x2a5   : > { %1974 = vrot.lane.b32.xlu0 %v2607_v6, %s2624_s11  ;;  %v2609_v7 = vpop.eup %2608 }
 0x2a8   : > { %v2611_v9 = vpop.eup %2610 }
 0x2a9   : > { %1976 = vrot.lane.b32.xlu1 %v2611_v9, %s2624_s11  ;;  %1978 = vrot.lane.b32.xlu0 %v2609_v7, %s2624_s11  ;;  %v2613_v11 = vpop.eup %2612 }
 0x2ad   : > { %1980 = vrot.lane.b32.xlu1 %v2613_v11, %s2624_s11 }
 0x2db   : > { %v1923_v21 = vpop.permute.xlu0 %1922 }
 0x2dc   : > { %v2016_v14 = vmul.f32 %v1923_v21, %v3104_v27 }
 0x2de   : > { %2048 = vst.msk [vmem:[%s3267_s15 + $0x10] sm:$0xff] %vm934_vm2, %v2016_v14 }
 0x2df   : > { %v1925_v16 = vpop.permute.xlu1 %1924  ;;  %v1919_v37 = vpop.permute.xlu0 %1918 }
 0x2e0   : > { %v2017_v45 = vmul.f32 %v1925_v16, %v3112_v32  ;;  %v2014_v19 = vmul.f32 %v1919_v37, %v3108_v1 }
 0x2e2   : > { %2049 = vst.msk [vmem:[%s3267_s15 + $0x18] sm:$0xff] %vm934_vm2, %v2017_v45  ;;  %2046 = vst.msk [vmem:[%s3267_s15] sm:$0xff] %vm934_vm2, %v2014_v19 }
 0x2e3   : > { %v1921_v20 = vpop.permute.xlu1 %1920  ;;  %v1931_v27 = vpop.permute.xlu0 %1930 }
 0x2e4   : > { %v2015_v26 = vmul.f32 %v1921_v20, %v3116_v31  ;;  %v2020_v25 = vmul.f32 %v1931_v27, %v3120_v33 }
 0x2e6   : > { %2047 = vst.msk [vmem:[%s3267_s15 + $0x8] sm:$0xff] %vm934_vm2, %v2015_v26  ;;  %2052 = vst.msk [vmem:[%s3267_s15 + $0x30] sm:$0xff] %vm934_vm2, %v2020_v25 }
 0x2e7   : > { %v1933_v46 = vpop.permute.xlu1 %1932  ;;  %v1927_v32 = vpop.permute.xlu0 %1926 }
 0x2e8   : > { %v2021_v1 = vmul.f32 %v1933_v46, %v3128_v8  ;;  %v2018_v12 = vmul.f32 %v1927_v32, %v3124_v23 }
 0x2ea   : > { %2053 = vst.msk [vmem:[%s3267_s15 + $0x38] sm:$0xff] %vm934_vm2, %v2021_v1  ;;  %2050 = vst.msk [vmem:[%s3267_s15 + $0x20] sm:$0xff] %vm934_vm2, %v2018_v12 }
 0x2eb   : > { %v1929_v31 = vpop.permute.xlu1 %1928 }
 0x2ec   : > { %v1939_v49 = vpop.permute.xlu0 %1938  ;;  %v2019_v33 = vmul.f32 %v1929_v31, %v3132_v35 }
 0x2ed   : > { %v2024_v52 = vmul.f32 %v1939_v49, %v3136_v24 }
 0x2ee   : > { %2051 = vst.msk [vmem:[%s3267_s15 + $0x28] sm:$0xff] %vm934_vm2, %v2019_v33 }
 0x2ef   : > { %2056 = vst.msk [vmem:[%s3267_s15 + $0x50] sm:$0xff] %vm934_vm2, %v2024_v52 }
 0x2f0   : > { %v1941_v5 = vpop.permute.xlu1 %1940  ;;  %v1935_v8 = vpop.permute.xlu0 %1934 }
 0x2f1   : > { %v2025_v23 = vmul.f32 %v1941_v5, %v3144_v38  ;;  %v2022_v61 = vmul.f32 %v1935_v8, %v3140_v62 }
 0x2f3   : > { %2057 = vst.msk [vmem:[%s3267_s15 + $0x58] sm:$0xff] %vm934_vm2, %v2025_v23  ;;  %2054 = vst.msk [vmem:[%s3267_s15 + $0x40] sm:$0xff] %vm934_vm2, %v2022_v61 }
 0x2f4   : > { %v1937_v53 = vpop.permute.xlu1 %1936 }
 0x2f5   : > { %v2023_v35 = vmul.f32 %v1937_v53, %v3148_v28  ;;  %v1947_v24 = vpop.permute.xlu0 %1946 }
 0x2f6   : > { %v2028_v42 = vmul.f32 %v1947_v24, %v3152_v51 }
 0x2f7   : > { %2055 = vst.msk [vmem:[%s3267_s15 + $0x48] sm:$0xff] %vm934_vm2, %v2023_v35 }
 0x2f8   : > { %2060 = vst.msk [vmem:[%s3267_s15 + $0x70] sm:$0xff] %vm934_vm2, %v2028_v42 }
 0x2f9   : > { %v1949_v54 = vpop.permute.xlu1 %1948  ;;  %v1943_v38 = vpop.permute.xlu0 %1942 }
 0x2fa   : > { %v2029_v62 = vmul.f32 %v1949_v54, %v3160_v56  ;;  %v2026_v44 = vmul.f32 %v1943_v38, %v3156_v36 }
 0x2fc   : > { %2061 = vst.msk [vmem:[%s3267_s15 + $0x78] sm:$0xff] %vm934_vm2, %v2029_v62  ;;  %2058 = vst.msk [vmem:[%s3267_s15 + $0x60] sm:$0xff] %vm934_vm2, %v2026_v44 }
 0x2fd   : > { %v1945_v28 = vpop.permute.xlu1 %1944  ;;  %v1955_v57 = vpop.permute.xlu0 %1954 }
 0x2fe   : > { %v2027_v51 = vmul.f32 %v1945_v28, %v3164_v10  ;;  %v2032_v41 = vmul.f32 %v1955_v57, %v3168_v30 }
 0x300   : > { %2059 = vst.msk [vmem:[%s3267_s15 + $0x68] sm:$0xff] %vm934_vm2, %v2027_v51  ;;  %2064 = vst.msk [vmem:[%s3267_s15 + $0x90] sm:$0xff] %vm934_vm2, %v2032_v41 }
 0x301   : > { %v1957_v47 = vpop.permute.xlu1 %1956  ;;  %v1951_v56 = vpop.permute.xlu0 %1950 }
 0x302   : > { %v2033_v36 = vmul.f32 %v1957_v47, %v3177_v50  ;;  %v2030_v15 = vmul.f32 %v1951_v56, %v3173_v3 }
 0x304   : > { %2065 = vst.msk [vmem:[%s3267_s15 + $0x98] sm:$0xff] %vm934_vm2, %v2033_v36  ;;  %2062 = vst.msk [vmem:[%s3267_s15 + $0x80] sm:$0xff] %vm934_vm2, %v2030_v15 }
 0x305   : > { %v1953_v59 = vpop.permute.xlu1 %1952  ;;  %v1963_v10 = vpop.permute.xlu0 %1962 }
 0x306   : > { %v2031_v30 = vmul.f32 %v1953_v59, %v3183_v17  ;;  %v2036_v34 = vmul.f32 %v1963_v10, %v3187_v48 }
 0x308   : > { %2063 = vst.msk [vmem:[%s3267_s15 + $0x88] sm:$0xff] %vm934_vm2, %v2031_v30  ;;  %2068 = vst.msk [vmem:[%s3267_s15 + $0xb0] sm:$0xff] %vm934_vm2, %v2036_v34 }
 0x309   : > { %v1965_v39 = vpop.permute.xlu1 %1964  ;;  %v1959_v50 = vpop.permute.xlu0 %1958 }
 0x30a   : > { %v2037_v3 = vmul.f32 %v1965_v39, %v3197_v29  ;;  %v2034_v63 = vmul.f32 %v1959_v50, %v3192_v40 }
 0x30c   : > { %2069 = vst.msk [vmem:[%s3267_s15 + $0xb8] sm:$0xff] %vm934_vm2, %v2037_v3  ;;  %2066 = vst.msk [vmem:[%s3267_s15 + $0xa0] sm:$0xff] %vm934_vm2, %v2034_v63 }
 0x30d   : > { %v1961_v17 = vpop.permute.xlu1 %1960  ;;  %v1971_v0 = vpop.permute.xlu0 %1970 }
 0x30e   : > { %v2035_v48 = vmul.f32 %v1961_v17, %v3201_v43  ;;  %v2040_v6 = vmul.f32 %v1971_v0, %v3207_v60 }
 0x310   : > { %2067 = vst.msk [vmem:[%s3267_s15 + $0xa8] sm:$0xff] %vm934_vm2, %v2035_v48  ;;  %2072 = vst.msk [vmem:[%s3267_s15 + $0xd0] sm:$0xff] %vm934_vm2, %v2040_v6 }
 0x311   : > { %v1973_v7 = vpop.permute.xlu1 %1972  ;;  %v1967_v29 = vpop.permute.xlu0 %1966 }
 0x312   : > { %v2041_v40 = vmul.f32 %v1973_v7, %v3217_v13  ;;  %v2038_v9 = vmul.f32 %v1967_v29, %v3211_v4 }
 0x314   : > { %2073 = vst.msk [vmem:[%s3267_s15 + $0xd8] sm:$0xff] %vm934_vm2, %v2041_v40  ;;  %2070 = vst.msk [vmem:[%s3267_s15 + $0xc0] sm:$0xff] %vm934_vm2, %v2038_v9 }
 0x315   : > { %v1969_v43 = vpop.permute.xlu1 %1968 }
 0x316   : > { %v2039_v60 = vmul.f32 %v1969_v43, %v3221_v22 }
 0x317   : > { %v1975_v11 = vpop.permute.xlu0 %1974 }
 0x318   : > { %2071 = vst.msk [vmem:[%s3267_s15 + $0xc8] sm:$0xff] %vm934_vm2, %v2039_v60  ;;  %v2042_v21 = vmul.f32 %v1975_v11, %v3231_v55 }
 0x31a   : > { %2074 = vst.msk [vmem:[%s3267_s15 + $0xe0] sm:$0xff] %vm934_vm2, %v2042_v21 }
 0x31b   : > { %v1977_v14 = vpop.permute.xlu1 %1976  ;;  %v1979_v16 = vpop.permute.xlu0 %1978 }
 0x31c   : > { %v2043_v13 = vmul.f32 %v1977_v14, %v3241_v2  ;;  %v2044_v4 = vmul.f32 %v1979_v16, %v3227_v18 }
 0x31e   : > { %2075 = vst.msk [vmem:[%s3267_s15 + $0xe8] sm:$0xff] %vm934_vm2, %v2043_v13  ;;  %2076 = vst.msk [vmem:[%s3267_s15 + $0xf0] sm:$0xff] %vm934_vm2, %v2044_v4 }
 0x31f   : > { %v1981_v37 = vpop.permute.xlu1 %1980 }
 0x320   : > { %v2045_v22 = vmul.f32 %v1981_v37, %v3237_v58 }
 0x322   : > { %2077 = vst.msk [vmem:[%s3267_s15 + $0xf8] sm:$0xff] %vm934_vm2, %v2045_v22 }
 0x323 PF: > { %s19_s30 = sadd.s32 1, %s2620_s30  }
 0x324   : > { %p16_p4 = scmp.ge.s32.totalorder %s19_s30, 4  }
 0x326   :  { %18 = sbr.rel (!%p16_p4) target bundleno = 1 (0x1), region = 92 }

</bundles_post_ra>
